<compile_context>
chip_gen: v6e
topology: v6e:2x2x1
jax: 0.10.0
libtpu: 0.0.40
codegen_flags: <defaults>
</compile_context>

<pallas_src>
import jax
import jax.numpy as jnp
from jax.experimental import pallas as pl
from jax.experimental.pallas import tpu as pltpu


def _round_up(n, m):
    return ((n + m - 1) // m) * m


def _pad_gatewise_last(a, h, hp):
    """Pad the last axis (size 3*h, gate order r,z,n) gate-wise to 3*hp."""
    if hp == h:
        return a
    parts = jnp.split(a, 3, axis=-1)
    pad = [(0, 0)] * (a.ndim - 1) + [(0, hp - h)]
    return jnp.concatenate([jnp.pad(p, pad) for p in parts], axis=-1)


def _choose_batch_block(b):
    # v7x megacore: split the batch across the 2 TensorCores only when each
    # half stays sublane-dense (multiple of 8 rows).  No effect on v5e/v6e.
    if b % 2 == 0 and (b // 2) % 8 == 0:
        return b // 2
    return b


def _choose_time_tile(t, bb, hp, budget_bytes=40 << 20):
    # Double-buffered per-step streamed VMEM: x_proj (3Hp) + out (Hp), f32.
    # 40 MiB budget leaves headroom under v7x's 64 MiB physical VMEM.
    per_step = 2 * bb * (3 * hp + hp) * 4
    return int(max(1, min(t, budget_bytes // per_step)))


def _make_gru_kernel(tt, total_t, hp, ragged):
    """Build the recurrence kernel for a (Tt, Bb, 3Hp) x_proj tile."""

    def kernel(xproj_ref, whh_ref, bhn_ref, h0_ref, out_ref, hn_ref, h_carry):
        t_idx = pl.program_id(1)

        @pl.when(t_idx == 0)
        def _():
            h_carry[...] = h0_ref[...]          # start of this batch block

        # Hoist loop-invariant loads / broadcasts out of the time loop.
        w_hh = whh_ref[...]                                         # (Hp, 3Hp)
        bb = h0_ref.shape[0]
        b_hn = jnp.broadcast_to(bhn_ref[...], (bb, hp))              # (Bb, Hp)
        t_base = t_idx * tt

        def step(k, h_prev):
            gi = xproj_ref[k].astype(jnp.float32)                    # (Bb, 3Hp)
            # Single fused hidden-gate matmul (hidden r/z biases already folded
            # into gi by the wrapper), f32 accumulation on the MXU.
            gh = jnp.dot(h_prev.astype(w_hh.dtype), w_hh,
                         preferred_element_type=jnp.float32)         # (Bb, 3Hp)
            # r|z with one fused sigmoid over the stacked (Bb, 2Hp) slab.
            rz = jax.nn.sigmoid(gi[:, : 2 * hp] + gh[:, : 2 * hp])
            r, z = rz[:, :hp], rz[:, hp:]
            n = jnp.tanh(gi[:, 2 * hp:] + r * (gh[:, 2 * hp:] + b_hn))
            h_new = (1.0 - z) * n + z * h_prev
            if ragged:  # mask steps past the true sequence end (edge tile only)
                h_new = jnp.where(t_base + k < total_t, h_new, h_prev)
            out_ref[k] = h_new                                       # lane-dense store
            return h_new

        h_final = jax.lax.fori_loop(0, tt, step, h_carry[...],
                                    unroll=tt if tt <= 16 else 8)
        h_carry[...] = h_final                  # carry across time tiles

        @pl.when(t_idx == pl.num_programs(1) - 1)
        def _():
            hn_ref[...] = h_final               # written once per batch block

    return kernel


def gru_recurrence(x_proj, w_hh, b_hn, h0):
    """Sequential GRU recurrence (time-major, padded hidden width Hp).

    x_proj : (T, B, 3Hp)  x_t @ W_ih + b_ih (+ folded r/z hidden biases)
    w_hh   : (Hp, 3Hp)    fused hidden->hidden weights (gate order r,z,n)
    b_hn   : (1, Hp)      n-gate hidden bias (applied inside r*(...))
    h0     : (B, Hp)      initial hidden state
    Returns (out (T, B, Hp) f32, h_n (B, Hp) f32).
    """
    t_total, b_total, h3 = x_proj.shape
    hp = h0.shape[-1]
    assert h3 == 3 * hp

    bb = _choose_batch_block(b_total)
    tt = _choose_time_tile(t_total, bb, hp)
    ragged = (t_total % tt) != 0
    n_b = b_total // bb
    n_t = pl.cdiv(t_total, tt)

    grid_spec = pltpu.PrefetchScalarGridSpec(
        num_scalar_prefetch=0,
        grid=(n_b, n_t),
        in_specs=[
            pl.BlockSpec((tt, bb, h3), lambda b, t: (t, b, 0)),   # x_proj (streamed)
            pl.BlockSpec((hp, h3), lambda b, t: (0, 0)),          # W_hh (resident)
            pl.BlockSpec((1, hp), lambda b, t: (0, 0)),           # b_hn (resident)
            pl.BlockSpec((bb, hp), lambda b, t: (b, 0)),          # h0
        ],
        out_specs=[
            pl.BlockSpec((tt, bb, hp), lambda b, t: (t, b, 0)),   # output (streamed)
            pl.BlockSpec((bb, hp), lambda b, t: (b, 0)),          # final hidden
        ],
        scratch_shapes=[pltpu.VMEM((bb, hp), jnp.float32)],       # h carry
    )

    # VMEM: double-buffered streamed tiles + resident params + carry scratch.
    est = (2 * tt * bb * (3 * hp + hp) * 4
           + 2 * (hp * 3 * hp * w_hh.dtype.itemsize + hp * 4 + bb * hp * 4)
           + 2 * bb * hp * 4
           + bb * hp * 4)
    vmem_limit = int(min(max(2 * est, 16 << 20), 56 << 20))  # stay under v7x 64 MiB

    cost = pl.CostEstimate(
        flops=2 * t_total * b_total * hp * 3 * hp,
        transcendentals=3 * t_total * b_total * hp,
        bytes_accessed=(x_proj.size * x_proj.dtype.itemsize
                        + t_total * b_total * hp * 4
                        + w_hh.size * w_hh.dtype.itemsize
                        + 3 * b_total * hp * 4),
    )

    out, h_n = pl.pallas_call(
        _make_gru_kernel(tt, t_total, hp, ragged),
        out_shape=(
            jax.ShapeDtypeStruct((t_total, b_total, hp), jnp.float32),
            jax.ShapeDtypeStruct((b_total, hp), jnp.float32),
        ),
        grid_spec=grid_spec,
        compiler_params=pltpu.CompilerParams(
            dimension_semantics=("parallel", "arbitrary"),  # batch x time(carry)
            vmem_limit_bytes=vmem_limit,
        ),
        cost_estimate=cost,
    )(x_proj, w_hh, b_hn, h0)
    return out, h_n


def init_params(key, vocab_size, embedding_dim, hidden_size):
    """Parameters in kernel-friendly (transposed, gate-concatenated) layout.

      embedding : (V, E)
      w_ih      : (E, 3H)   (PyTorch weight_ih_l0 is (3H, E); gate order r,z,n)
      w_hh      : (H, 3H)
      b_ih,b_hh : (3H,)
    """
    k1, k2, k3, k4, k5 = jax.random.split(key, 5)
    s = 1.0 / jnp.sqrt(hidden_size)
    return {
        "embedding": jax.random.normal(k1, (vocab_size, embedding_dim), jnp.float32),
        "w_ih": jax.random.uniform(k2, (embedding_dim, 3 * hidden_size), jnp.float32, -s, s),
        "w_hh": jax.random.uniform(k3, (hidden_size, 3 * hidden_size), jnp.float32, -s, s),
        "b_ih": jax.random.uniform(k4, (3 * hidden_size,), jnp.float32, -s, s),
        "b_hh": jax.random.uniform(k5, (3 * hidden_size,), jnp.float32, -s, s),
    }


@jax.jit
def encoder_gru_forward(params, x, hidden=None):
    """Forward pass of EncoderGRU (num_layers=1, bidirectional=False).

    x: (B, T) int32 token ids.
    Returns (output (B, T, H), hidden (1, B, H)) — same as the PyTorch module.
    """
    b, t = x.shape
    h = params["w_hh"].shape[0]
    hp = _round_up(h, 128)   # lane-dense padded hidden width

    if hidden is None:
        hidden = jnp.zeros((1, b, h), jnp.float32)   # init_hidden

    # MXU-operand dtype: stream x_proj / W_hh in bf16 once Hp is large enough
    # that VMEM/HBM traffic dominates; all gate math stays in f32.
    compute_dtype = jnp.bfloat16 if hp >= 256 else jnp.float32

    # Time-major gather (x.T): avoids an HBM round-trip transpose of the much
    # larger f32 x_proj activation later.
    embedded = params["embedding"][x.T]                           # (T, B, E)

    # Gate-wise zero-pad parameters to the padded hidden width; fold the r/z
    # hidden biases into the hoisted input projection (mathematically exact).
    w_ih_p = _pad_gatewise_last(params["w_ih"], h, hp)            # (E, 3Hp)
    b_fold = params["b_ih"].at[: 2 * h].add(params["b_hh"][: 2 * h])
    b_fold_p = _pad_gatewise_last(b_fold, h, hp)                  # (3Hp,)
    w_hh_p = _pad_gatewise_last(params["w_hh"], h, hp)            # (H, 3Hp)
    w_hh_p = jnp.pad(w_hh_p, ((0, hp - h), (0, 0)))               # (Hp, 3Hp)
    b_hn_p = jnp.pad(params["b_hh"][2 * h:], (0, hp - h))[None]   # (1, Hp)
    h0_p = jnp.pad(hidden[0], ((0, 0), (0, hp - h)))              # (B, Hp)

    # Hoisted input projection: one big MXU-friendly batched matmul, off the
    # sequential critical path, produced directly time-major (no transpose).
    x_proj = (embedded @ w_ih_p + b_fold_p).astype(compute_dtype)  # (T, B, 3Hp)

    out_tm, hn_p = gru_recurrence(x_proj, w_hh_p.astype(compute_dtype),
                                  b_hn_p, h0_p)

    # Single mandatory batch_first transpose at the consumer.
    output = jnp.transpose(out_tm[:, :, :h], (1, 0, 2))           # (B, T, H)
    return output, hn_p[:, :h][None]                              # (1, B, H)


def _reference_forward(params, x):
    """Pure-JAX reference (lax.scan) for validation."""
    B, T = x.shape
    H = params["w_hh"].shape[0]
    embedded = params["embedding"][x]                # (B, T, E)
    xs = jnp.transpose(embedded, (1, 0, 2))          # (T, B, E)

    def step(h, x_t):
        gi = x_t @ params["w_ih"] + params["b_ih"]
        gh = h @ params["w_hh"] + params["b_hh"]
        i_r, i_z, i_n = jnp.split(gi, 3, axis=-1)
        h_r, h_z, h_n = jnp.split(gh, 3, axis=-1)
        r = jax.nn.sigmoid(i_r + h_r)
        z = jax.nn.sigmoid(i_z + h_z)
        n = jnp.tanh(i_n + r * h_n)
        h_new = (1.0 - z) * n + z * h
        return h_new, h_new

    h0 = jnp.zeros((B, H), jnp.float32)
    h_n, outs = jax.lax.scan(step, h0, xs)
    return jnp.transpose(outs, (1, 0, 2)), h_n[None]


if __name__ == "__main__":
    vocab_size, embedding_dim, hidden_size = 50, 32, 32
    B, T = 2, 8

    key = jax.random.PRNGKey(0)
    pkey, xkey = jax.random.split(key)
    params = init_params(pkey, vocab_size, embedding_dim, hidden_size)
    x = jax.random.randint(xkey, (B, T), 0, vocab_size, dtype=jnp.int32)

    output, hidden = encoder_gru_forward(params, x)
    output, hidden = jax.block_until_ready((output, hidden))

    ref_out, ref_hidden = _reference_forward(params, x)
    assert output.shape == (B, T, hidden_size)
    assert hidden.shape == (1, B, hidden_size)
    assert jnp.allclose(output, ref_out, atol=2e-5, rtol=1e-5)
    assert jnp.allclose(hidden, ref_hidden, atol=2e-5, rtol=1e-5)

    print("KERNEL_OK")
</pallas_src>

<mosaic_0001>
module attributes {stable_mosaic.version = 11 : i64} {
  func.func @kernel(%arg0: i32, %arg1: i32, %arg2: memref<8x2x384xf32, #tpu.memory_space<vmem>>, %arg3: memref<128x384xf32, #tpu.memory_space<vmem>>, %arg4: memref<1x128xf32, #tpu.memory_space<vmem>>, %arg5: memref<2x128xf32, #tpu.memory_space<vmem>>, %arg6: memref<8x2x128xf32, #tpu.memory_space<vmem>>, %arg7: memref<2x128xf32, #tpu.memory_space<vmem>>, %arg8: memref<2x128xf32, #tpu.memory_space<vmem>>) attributes {dimension_semantics = [#tpu.dimension_semantics<parallel>, #tpu.dimension_semantics<arbitrary>], iteration_bounds = array<i64: 1, 1>, scalar_prefetch = 0 : i64, scratch_operands = 1 : i64, tpu.core_type = #tpu.core_type<tc>, window_params = [{transform_indices = @transform_0, window_bounds = array<i64: 8, 2, 384>}, {pipeline_mode = #tpu.pipeline_mode<synchronous>, transform_indices = @transform_1, window_bounds = array<i64: 128, 384>}, {pipeline_mode = #tpu.pipeline_mode<synchronous>, transform_indices = @transform_2, window_bounds = array<i64: 1, 128>}, {transform_indices = @transform_3, window_bounds = array<i64: 2, 128>}, {transform_indices = @transform_4, window_bounds = array<i64: 8, 2, 128>}, {transform_indices = @transform_5, window_bounds = array<i64: 2, 128>}]} {
    %c0_i32 = arith.constant 0 : i32
    %0 = arith.cmpi eq, %arg1, %c0_i32 : i32
    %1 = arith.extui %0 : i1 to i32
    %c0_i32_0 = arith.constant 0 : i32
    %2 = arith.cmpi ne, %1, %c0_i32_0 : i32
    scf.if %2 {
      %c0_66 = arith.constant 0 : index
      %c0_67 = arith.constant 0 : index
      %244 = vector.load %arg5[%c0_66, %c0_67] : memref<2x128xf32, #tpu.memory_space<vmem>>, vector<2x128xf32>
      %c0_68 = arith.constant 0 : index
      %c0_69 = arith.constant 0 : index
      %245 = vector.load %arg8[%c0_68, %c0_69] : memref<2x128xf32, #tpu.memory_space<vmem>>, vector<2x128xf32>
      tpu.vector_store %arg8[%c0_68, %c0_69], %244 {strides = array<i32>} : memref<2x128xf32, #tpu.memory_space<vmem>>, vector<2x128xf32>,
    } else {
    }
    %c0 = arith.constant 0 : index
    %c0_1 = arith.constant 0 : index
    %3 = vector.load %arg3[%c0, %c0_1] : memref<128x384xf32, #tpu.memory_space<vmem>>, vector<128x384xf32>
    %c0_2 = arith.constant 0 : index
    %c0_3 = arith.constant 0 : index
    %4 = vector.load %arg4[%c0_2, %c0_3] : memref<1x128xf32, #tpu.memory_space<vmem>>, vector<1x128xf32>
    %5 = vector.shape_cast %4 : vector<1x128xf32> to vector<1x128xf32>
    %6 = vector.broadcast %5 : vector<1x128xf32> to vector<2x128xf32>
    %c0_4 = arith.constant 0 : index
    %c0_5 = arith.constant 0 : index
    %7 = vector.load %arg8[%c0_4, %c0_5] : memref<2x128xf32, #tpu.memory_space<vmem>>, vector<2x128xf32>
    %c0_i32_6 = arith.constant 0 : i32
    %8 = arith.index_cast %c0_i32_6 : i32 to index
    %c0_7 = arith.constant 0 : index
    %c0_8 = arith.constant 0 : index
    %9 = vector.load %arg2[%8, %c0_7, %c0_8] : memref<8x2x384xf32, #tpu.memory_space<vmem>>, vector<1x2x384xf32>
    %10 = vector.shape_cast %9 : vector<1x2x384xf32> to vector<2x384xf32>
    %cst = arith.constant dense<0.000000e+00> : vector<2x384xf32>
    %11 = tpu.matmul %7, %3, %cst {dimension_numbers = #tpu.dot_dimension_numbers<[1], [0], [0], [1], [0, 0, 1, 1], [], []>} : vector<2x128xf32>, vector<128x384xf32>, vector<2x384xf32> -> vector<2x384xf32>
    %12 = vector.extract_strided_slice %10 {offsets = [0, 0], sizes = [2, 256], strides = [1, 1]} : vector<2x384xf32> to vector<2x256xf32>
    %13 = vector.extract_strided_slice %11 {offsets = [0, 0], sizes = [2, 256], strides = [1, 1]} : vector<2x384xf32> to vector<2x256xf32>
    %14 = arith.addf %12, %13 : vector<2x256xf32>
    %15 = arith.negf %14 : vector<2x256xf32>
    %16 = math.exp %15 : vector<2x256xf32>
    %cst_9 = arith.constant 1.000000e+00 : f32
    %17 = vector.broadcast %cst_9 : f32 to vector<2x256xf32>
    %18 = arith.addf %17, %16 : vector<2x256xf32>
    %19 = arith.divf %17, %18 : vector<2x256xf32>
    %20 = vector.extract_strided_slice %19 {offsets = [0, 0], sizes = [2, 128], strides = [1, 1]} : vector<2x256xf32> to vector<2x128xf32>
    %21 = vector.extract_strided_slice %19 {offsets = [0, 128], sizes = [2, 128], strides = [1, 1]} : vector<2x256xf32> to vector<2x128xf32>
    %22 = vector.extract_strided_slice %10 {offsets = [0, 256], sizes = [2, 128], strides = [1, 1]} : vector<2x384xf32> to vector<2x128xf32>
    %23 = vector.extract_strided_slice %11 {offsets = [0, 256], sizes = [2, 128], strides = [1, 1]} : vector<2x384xf32> to vector<2x128xf32>
    %24 = arith.addf %23, %6 : vector<2x128xf32>
    %25 = arith.mulf %20, %24 : vector<2x128xf32>
    %26 = arith.addf %22, %25 : vector<2x128xf32>
    %27 = math.tanh %26 : vector<2x128xf32>
    %cst_10 = arith.constant 1.000000e+00 : f32
    %28 = vector.broadcast %cst_10 : f32 to vector<2x128xf32>
    %29 = arith.subf %28, %21 : vector<2x128xf32>
    %30 = arith.mulf %29, %27 : vector<2x128xf32>
    %31 = arith.mulf %21, %7 : vector<2x128xf32>
    %32 = arith.addf %30, %31 : vector<2x128xf32>
    %33 = arith.index_cast %c0_i32_6 : i32 to index
    %c0_11 = arith.constant 0 : index
    %c0_12 = arith.constant 0 : index
    %34 = vector.load %arg6[%33, %c0_11, %c0_12] : memref<8x2x128xf32, #tpu.memory_space<vmem>>, vector<1x2x128xf32>
    %35 = vector.shape_cast %34 : vector<1x2x128xf32> to vector<2x128xf32>
    %36 = vector.shape_cast %32 : vector<2x128xf32> to vector<1x2x128xf32>
    tpu.vector_store %arg6[%33, %c0_11, %c0_12], %36 {strides = array<i32>} : memref<8x2x128xf32, #tpu.memory_space<vmem>>, vector<1x2x128xf32>,
    %c1_i32 = arith.constant 1 : i32
    %37 = arith.index_cast %c1_i32 : i32 to index
    %c0_13 = arith.constant 0 : index
    %c0_14 = arith.constant 0 : index
    %38 = vector.load %arg2[%37, %c0_13, %c0_14] : memref<8x2x384xf32, #tpu.memory_space<vmem>>, vector<1x2x384xf32>
    %39 = vector.shape_cast %38 : vector<1x2x384xf32> to vector<2x384xf32>
    %cst_15 = arith.constant dense<0.000000e+00> : vector<2x384xf32>
    %40 = tpu.matmul %32, %3, %cst_15 {dimension_numbers = #tpu.dot_dimension_numbers<[1], [0], [0], [1], [0, 0, 1, 1], [], []>} : vector<2x128xf32>, vector<128x384xf32>, vector<2x384xf32> -> vector<2x384xf32>
    %41 = vector.extract_strided_slice %39 {offsets = [0, 0], sizes = [2, 256], strides = [1, 1]} : vector<2x384xf32> to vector<2x256xf32>
    %42 = vector.extract_strided_slice %40 {offsets = [0, 0], sizes = [2, 256], strides = [1, 1]} : vector<2x384xf32> to vector<2x256xf32>
    %43 = arith.addf %41, %42 : vector<2x256xf32>
    %44 = arith.negf %43 : vector<2x256xf32>
    %45 = math.exp %44 : vector<2x256xf32>
    %cst_16 = arith.constant 1.000000e+00 : f32
    %46 = vector.broadcast %cst_16 : f32 to vector<2x256xf32>
    %47 = arith.addf %46, %45 : vector<2x256xf32>
    %48 = arith.divf %46, %47 : vector<2x256xf32>
    %49 = vector.extract_strided_slice %48 {offsets = [0, 0], sizes = [2, 128], strides = [1, 1]} : vector<2x256xf32> to vector<2x128xf32>
    %50 = vector.extract_strided_slice %48 {offsets = [0, 128], sizes = [2, 128], strides = [1, 1]} : vector<2x256xf32> to vector<2x128xf32>
    %51 = vector.extract_strided_slice %39 {offsets = [0, 256], sizes = [2, 128], strides = [1, 1]} : vector<2x384xf32> to vector<2x128xf32>
    %52 = vector.extract_strided_slice %40 {offsets = [0, 256], sizes = [2, 128], strides = [1, 1]} : vector<2x384xf32> to vector<2x128xf32>
    %53 = arith.addf %52, %6 : vector<2x128xf32>
    %54 = arith.mulf %49, %53 : vector<2x128xf32>
    %55 = arith.addf %51, %54 : vector<2x128xf32>
    %56 = math.tanh %55 : vector<2x128xf32>
    %cst_17 = arith.constant 1.000000e+00 : f32
    %57 = vector.broadcast %cst_17 : f32 to vector<2x128xf32>
    %58 = arith.subf %57, %50 : vector<2x128xf32>
    %59 = arith.mulf %58, %56 : vector<2x128xf32>
    %60 = arith.mulf %50, %32 : vector<2x128xf32>
    %61 = arith.addf %59, %60 : vector<2x128xf32>
    %62 = arith.index_cast %c1_i32 : i32 to index
    %c0_18 = arith.constant 0 : index
    %c0_19 = arith.constant 0 : index
    %63 = vector.load %arg6[%62, %c0_18, %c0_19] : memref<8x2x128xf32, #tpu.memory_space<vmem>>, vector<1x2x128xf32>
    %64 = vector.shape_cast %63 : vector<1x2x128xf32> to vector<2x128xf32>
    %65 = vector.shape_cast %61 : vector<2x128xf32> to vector<1x2x128xf32>
    tpu.vector_store %arg6[%62, %c0_18, %c0_19], %65 {strides = array<i32>} : memref<8x2x128xf32, #tpu.memory_space<vmem>>, vector<1x2x128xf32>,
    %c2_i32 = arith.constant 2 : i32
    %66 = arith.index_cast %c2_i32 : i32 to index
    %c0_20 = arith.constant 0 : index
    %c0_21 = arith.constant 0 : index
    %67 = vector.load %arg2[%66, %c0_20, %c0_21] : memref<8x2x384xf32, #tpu.memory_space<vmem>>, vector<1x2x384xf32>
    %68 = vector.shape_cast %67 : vector<1x2x384xf32> to vector<2x384xf32>
    %cst_22 = arith.constant dense<0.000000e+00> : vector<2x384xf32>
    %69 = tpu.matmul %61, %3, %cst_22 {dimension_numbers = #tpu.dot_dimension_numbers<[1], [0], [0], [1], [0, 0, 1, 1], [], []>} : vector<2x128xf32>, vector<128x384xf32>, vector<2x384xf32> -> vector<2x384xf32>
    %70 = vector.extract_strided_slice %68 {offsets = [0, 0], sizes = [2, 256], strides = [1, 1]} : vector<2x384xf32> to vector<2x256xf32>
    %71 = vector.extract_strided_slice %69 {offsets = [0, 0], sizes = [2, 256], strides = [1, 1]} : vector<2x384xf32> to vector<2x256xf32>
    %72 = arith.addf %70, %71 : vector<2x256xf32>
    %73 = arith.negf %72 : vector<2x256xf32>
    %74 = math.exp %73 : vector<2x256xf32>
    %cst_23 = arith.constant 1.000000e+00 : f32
    %75 = vector.broadcast %cst_23 : f32 to vector<2x256xf32>
    %76 = arith.addf %75, %74 : vector<2x256xf32>
    %77 = arith.divf %75, %76 : vector<2x256xf32>
    %78 = vector.extract_strided_slice %77 {offsets = [0, 0], sizes = [2, 128], strides = [1, 1]} : vector<2x256xf32> to vector<2x128xf32>
    %79 = vector.extract_strided_slice %77 {offsets = [0, 128], sizes = [2, 128], strides = [1, 1]} : vector<2x256xf32> to vector<2x128xf32>
    %80 = vector.extract_strided_slice %68 {offsets = [0, 256], sizes = [2, 128], strides = [1, 1]} : vector<2x384xf32> to vector<2x128xf32>
    %81 = vector.extract_strided_slice %69 {offsets = [0, 256], sizes = [2, 128], strides = [1, 1]} : vector<2x384xf32> to vector<2x128xf32>
    %82 = arith.addf %81, %6 : vector<2x128xf32>
    %83 = arith.mulf %78, %82 : vector<2x128xf32>
    %84 = arith.addf %80, %83 : vector<2x128xf32>
    %85 = math.tanh %84 : vector<2x128xf32>
    %cst_24 = arith.constant 1.000000e+00 : f32
    %86 = vector.broadcast %cst_24 : f32 to vector<2x128xf32>
    %87 = arith.subf %86, %79 : vector<2x128xf32>
    %88 = arith.mulf %87, %85 : vector<2x128xf32>
    %89 = arith.mulf %79, %61 : vector<2x128xf32>
    %90 = arith.addf %88, %89 : vector<2x128xf32>
    %91 = arith.index_cast %c2_i32 : i32 to index
    %c0_25 = arith.constant 0 : index
    %c0_26 = arith.constant 0 : index
    %92 = vector.load %arg6[%91, %c0_25, %c0_26] : memref<8x2x128xf32, #tpu.memory_space<vmem>>, vector<1x2x128xf32>
    %93 = vector.shape_cast %92 : vector<1x2x128xf32> to vector<2x128xf32>
    %94 = vector.shape_cast %90 : vector<2x128xf32> to vector<1x2x128xf32>
    tpu.vector_store %arg6[%91, %c0_25, %c0_26], %94 {strides = array<i32>} : memref<8x2x128xf32, #tpu.memory_space<vmem>>, vector<1x2x128xf32>,
    %c3_i32 = arith.constant 3 : i32
    %95 = arith.index_cast %c3_i32 : i32 to index
    %c0_27 = arith.constant 0 : index
    %c0_28 = arith.constant 0 : index
    %96 = vector.load %arg2[%95, %c0_27, %c0_28] : memref<8x2x384xf32, #tpu.memory_space<vmem>>, vector<1x2x384xf32>
    %97 = vector.shape_cast %96 : vector<1x2x384xf32> to vector<2x384xf32>
    %cst_29 = arith.constant dense<0.000000e+00> : vector<2x384xf32>
    %98 = tpu.matmul %90, %3, %cst_29 {dimension_numbers = #tpu.dot_dimension_numbers<[1], [0], [0], [1], [0, 0, 1, 1], [], []>} : vector<2x128xf32>, vector<128x384xf32>, vector<2x384xf32> -> vector<2x384xf32>
    %99 = vector.extract_strided_slice %97 {offsets = [0, 0], sizes = [2, 256], strides = [1, 1]} : vector<2x384xf32> to vector<2x256xf32>
    %100 = vector.extract_strided_slice %98 {offsets = [0, 0], sizes = [2, 256], strides = [1, 1]} : vector<2x384xf32> to vector<2x256xf32>
    %101 = arith.addf %99, %100 : vector<2x256xf32>
    %102 = arith.negf %101 : vector<2x256xf32>
    %103 = math.exp %102 : vector<2x256xf32>
    %cst_30 = arith.constant 1.000000e+00 : f32
    %104 = vector.broadcast %cst_30 : f32 to vector<2x256xf32>
    %105 = arith.addf %104, %103 : vector<2x256xf32>
    %106 = arith.divf %104, %105 : vector<2x256xf32>
    %107 = vector.extract_strided_slice %106 {offsets = [0, 0], sizes = [2, 128], strides = [1, 1]} : vector<2x256xf32> to vector<2x128xf32>
    %108 = vector.extract_strided_slice %106 {offsets = [0, 128], sizes = [2, 128], strides = [1, 1]} : vector<2x256xf32> to vector<2x128xf32>
    %109 = vector.extract_strided_slice %97 {offsets = [0, 256], sizes = [2, 128], strides = [1, 1]} : vector<2x384xf32> to vector<2x128xf32>
    %110 = vector.extract_strided_slice %98 {offsets = [0, 256], sizes = [2, 128], strides = [1, 1]} : vector<2x384xf32> to vector<2x128xf32>
    %111 = arith.addf %110, %6 : vector<2x128xf32>
    %112 = arith.mulf %107, %111 : vector<2x128xf32>
    %113 = arith.addf %109, %112 : vector<2x128xf32>
    %114 = math.tanh %113 : vector<2x128xf32>
    %cst_31 = arith.constant 1.000000e+00 : f32
    %115 = vector.broadcast %cst_31 : f32 to vector<2x128xf32>
    %116 = arith.subf %115, %108 : vector<2x128xf32>
    %117 = arith.mulf %116, %114 : vector<2x128xf32>
    %118 = arith.mulf %108, %90 : vector<2x128xf32>
    %119 = arith.addf %117, %118 : vector<2x128xf32>
    %120 = arith.index_cast %c3_i32 : i32 to index
    %c0_32 = arith.constant 0 : index
    %c0_33 = arith.constant 0 : index
    %121 = vector.load %arg6[%120, %c0_32, %c0_33] : memref<8x2x128xf32, #tpu.memory_space<vmem>>, vector<1x2x128xf32>
    %122 = vector.shape_cast %121 : vector<1x2x128xf32> to vector<2x128xf32>
    %123 = vector.shape_cast %119 : vector<2x128xf32> to vector<1x2x128xf32>
    tpu.vector_store %arg6[%120, %c0_32, %c0_33], %123 {strides = array<i32>} : memref<8x2x128xf32, #tpu.memory_space<vmem>>, vector<1x2x128xf32>,
    %c4_i32 = arith.constant 4 : i32
    %124 = arith.index_cast %c4_i32 : i32 to index
    %c0_34 = arith.constant 0 : index
    %c0_35 = arith.constant 0 : index
    %125 = vector.load %arg2[%124, %c0_34, %c0_35] : memref<8x2x384xf32, #tpu.memory_space<vmem>>, vector<1x2x384xf32>
    %126 = vector.shape_cast %125 : vector<1x2x384xf32> to vector<2x384xf32>
    %cst_36 = arith.constant dense<0.000000e+00> : vector<2x384xf32>
    %127 = tpu.matmul %119, %3, %cst_36 {dimension_numbers = #tpu.dot_dimension_numbers<[1], [0], [0], [1], [0, 0, 1, 1], [], []>} : vector<2x128xf32>, vector<128x384xf32>, vector<2x384xf32> -> vector<2x384xf32>
    %128 = vector.extract_strided_slice %126 {offsets = [0, 0], sizes = [2, 256], strides = [1, 1]} : vector<2x384xf32> to vector<2x256xf32>
    %129 = vector.extract_strided_slice %127 {offsets = [0, 0], sizes = [2, 256], strides = [1, 1]} : vector<2x384xf32> to vector<2x256xf32>
    %130 = arith.addf %128, %129 : vector<2x256xf32>
    %131 = arith.negf %130 : vector<2x256xf32>
    %132 = math.exp %131 : vector<2x256xf32>
    %cst_37 = arith.constant 1.000000e+00 : f32
    %133 = vector.broadcast %cst_37 : f32 to vector<2x256xf32>
    %134 = arith.addf %133, %132 : vector<2x256xf32>
    %135 = arith.divf %133, %134 : vector<2x256xf32>
    %136 = vector.extract_strided_slice %135 {offsets = [0, 0], sizes = [2, 128], strides = [1, 1]} : vector<2x256xf32> to vector<2x128xf32>
    %137 = vector.extract_strided_slice %135 {offsets = [0, 128], sizes = [2, 128], strides = [1, 1]} : vector<2x256xf32> to vector<2x128xf32>
    %138 = vector.extract_strided_slice %126 {offsets = [0, 256], sizes = [2, 128], strides = [1, 1]} : vector<2x384xf32> to vector<2x128xf32>
    %139 = vector.extract_strided_slice %127 {offsets = [0, 256], sizes = [2, 128], strides = [1, 1]} : vector<2x384xf32> to vector<2x128xf32>
    %140 = arith.addf %139, %6 : vector<2x128xf32>
    %141 = arith.mulf %136, %140 : vector<2x128xf32>
    %142 = arith.addf %138, %141 : vector<2x128xf32>
    %143 = math.tanh %142 : vector<2x128xf32>
    %cst_38 = arith.constant 1.000000e+00 : f32
    %144 = vector.broadcast %cst_38 : f32 to vector<2x128xf32>
    %145 = arith.subf %144, %137 : vector<2x128xf32>
    %146 = arith.mulf %145, %143 : vector<2x128xf32>
    %147 = arith.mulf %137, %119 : vector<2x128xf32>
    %148 = arith.addf %146, %147 : vector<2x128xf32>
    %149 = arith.index_cast %c4_i32 : i32 to index
    %c0_39 = arith.constant 0 : index
    %c0_40 = arith.constant 0 : index
    %150 = vector.load %arg6[%149, %c0_39, %c0_40] : memref<8x2x128xf32, #tpu.memory_space<vmem>>, vector<1x2x128xf32>
    %151 = vector.shape_cast %150 : vector<1x2x128xf32> to vector<2x128xf32>
    %152 = vector.shape_cast %148 : vector<2x128xf32> to vector<1x2x128xf32>
    tpu.vector_store %arg6[%149, %c0_39, %c0_40], %152 {strides = array<i32>} : memref<8x2x128xf32, #tpu.memory_space<vmem>>, vector<1x2x128xf32>,
    %c5_i32 = arith.constant 5 : i32
    %153 = arith.index_cast %c5_i32 : i32 to index
    %c0_41 = arith.constant 0 : index
    %c0_42 = arith.constant 0 : index
    %154 = vector.load %arg2[%153, %c0_41, %c0_42] : memref<8x2x384xf32, #tpu.memory_space<vmem>>, vector<1x2x384xf32>
    %155 = vector.shape_cast %154 : vector<1x2x384xf32> to vector<2x384xf32>
    %cst_43 = arith.constant dense<0.000000e+00> : vector<2x384xf32>
    %156 = tpu.matmul %148, %3, %cst_43 {dimension_numbers = #tpu.dot_dimension_numbers<[1], [0], [0], [1], [0, 0, 1, 1], [], []>} : vector<2x128xf32>, vector<128x384xf32>, vector<2x384xf32> -> vector<2x384xf32>
    %157 = vector.extract_strided_slice %155 {offsets = [0, 0], sizes = [2, 256], strides = [1, 1]} : vector<2x384xf32> to vector<2x256xf32>
    %158 = vector.extract_strided_slice %156 {offsets = [0, 0], sizes = [2, 256], strides = [1, 1]} : vector<2x384xf32> to vector<2x256xf32>
    %159 = arith.addf %157, %158 : vector<2x256xf32>
    %160 = arith.negf %159 : vector<2x256xf32>
    %161 = math.exp %160 : vector<2x256xf32>
    %cst_44 = arith.constant 1.000000e+00 : f32
    %162 = vector.broadcast %cst_44 : f32 to vector<2x256xf32>
    %163 = arith.addf %162, %161 : vector<2x256xf32>
    %164 = arith.divf %162, %163 : vector<2x256xf32>
    %165 = vector.extract_strided_slice %164 {offsets = [0, 0], sizes = [2, 128], strides = [1, 1]} : vector<2x256xf32> to vector<2x128xf32>
    %166 = vector.extract_strided_slice %164 {offsets = [0, 128], sizes = [2, 128], strides = [1, 1]} : vector<2x256xf32> to vector<2x128xf32>
    %167 = vector.extract_strided_slice %155 {offsets = [0, 256], sizes = [2, 128], strides = [1, 1]} : vector<2x384xf32> to vector<2x128xf32>
    %168 = vector.extract_strided_slice %156 {offsets = [0, 256], sizes = [2, 128], strides = [1, 1]} : vector<2x384xf32> to vector<2x128xf32>
    %169 = arith.addf %168, %6 : vector<2x128xf32>
    %170 = arith.mulf %165, %169 : vector<2x128xf32>
    %171 = arith.addf %167, %170 : vector<2x128xf32>
    %172 = math.tanh %171 : vector<2x128xf32>
    %cst_45 = arith.constant 1.000000e+00 : f32
    %173 = vector.broadcast %cst_45 : f32 to vector<2x128xf32>
    %174 = arith.subf %173, %166 : vector<2x128xf32>
    %175 = arith.mulf %174, %172 : vector<2x128xf32>
    %176 = arith.mulf %166, %148 : vector<2x128xf32>
    %177 = arith.addf %175, %176 : vector<2x128xf32>
    %178 = arith.index_cast %c5_i32 : i32 to index
    %c0_46 = arith.constant 0 : index
    %c0_47 = arith.constant 0 : index
    %179 = vector.load %arg6[%178, %c0_46, %c0_47] : memref<8x2x128xf32, #tpu.memory_space<vmem>>, vector<1x2x128xf32>
    %180 = vector.shape_cast %179 : vector<1x2x128xf32> to vector<2x128xf32>
    %181 = vector.shape_cast %177 : vector<2x128xf32> to vector<1x2x128xf32>
    tpu.vector_store %arg6[%178, %c0_46, %c0_47], %181 {strides = array<i32>} : memref<8x2x128xf32, #tpu.memory_space<vmem>>, vector<1x2x128xf32>,
    %c6_i32 = arith.constant 6 : i32
    %182 = arith.index_cast %c6_i32 : i32 to index
    %c0_48 = arith.constant 0 : index
    %c0_49 = arith.constant 0 : index
    %183 = vector.load %arg2[%182, %c0_48, %c0_49] : memref<8x2x384xf32, #tpu.memory_space<vmem>>, vector<1x2x384xf32>
    %184 = vector.shape_cast %183 : vector<1x2x384xf32> to vector<2x384xf32>
    %cst_50 = arith.constant dense<0.000000e+00> : vector<2x384xf32>
    %185 = tpu.matmul %177, %3, %cst_50 {dimension_numbers = #tpu.dot_dimension_numbers<[1], [0], [0], [1], [0, 0, 1, 1], [], []>} : vector<2x128xf32>, vector<128x384xf32>, vector<2x384xf32> -> vector<2x384xf32>
    %186 = vector.extract_strided_slice %184 {offsets = [0, 0], sizes = [2, 256], strides = [1, 1]} : vector<2x384xf32> to vector<2x256xf32>
    %187 = vector.extract_strided_slice %185 {offsets = [0, 0], sizes = [2, 256], strides = [1, 1]} : vector<2x384xf32> to vector<2x256xf32>
    %188 = arith.addf %186, %187 : vector<2x256xf32>
    %189 = arith.negf %188 : vector<2x256xf32>
    %190 = math.exp %189 : vector<2x256xf32>
    %cst_51 = arith.constant 1.000000e+00 : f32
    %191 = vector.broadcast %cst_51 : f32 to vector<2x256xf32>
    %192 = arith.addf %191, %190 : vector<2x256xf32>
    %193 = arith.divf %191, %192 : vector<2x256xf32>
    %194 = vector.extract_strided_slice %193 {offsets = [0, 0], sizes = [2, 128], strides = [1, 1]} : vector<2x256xf32> to vector<2x128xf32>
    %195 = vector.extract_strided_slice %193 {offsets = [0, 128], sizes = [2, 128], strides = [1, 1]} : vector<2x256xf32> to vector<2x128xf32>
    %196 = vector.extract_strided_slice %184 {offsets = [0, 256], sizes = [2, 128], strides = [1, 1]} : vector<2x384xf32> to vector<2x128xf32>
    %197 = vector.extract_strided_slice %185 {offsets = [0, 256], sizes = [2, 128], strides = [1, 1]} : vector<2x384xf32> to vector<2x128xf32>
    %198 = arith.addf %197, %6 : vector<2x128xf32>
    %199 = arith.mulf %194, %198 : vector<2x128xf32>
    %200 = arith.addf %196, %199 : vector<2x128xf32>
    %201 = math.tanh %200 : vector<2x128xf32>
    %cst_52 = arith.constant 1.000000e+00 : f32
    %202 = vector.broadcast %cst_52 : f32 to vector<2x128xf32>
    %203 = arith.subf %202, %195 : vector<2x128xf32>
    %204 = arith.mulf %203, %201 : vector<2x128xf32>
    %205 = arith.mulf %195, %177 : vector<2x128xf32>
    %206 = arith.addf %204, %205 : vector<2x128xf32>
    %207 = arith.index_cast %c6_i32 : i32 to index
    %c0_53 = arith.constant 0 : index
    %c0_54 = arith.constant 0 : index
    %208 = vector.load %arg6[%207, %c0_53, %c0_54] : memref<8x2x128xf32, #tpu.memory_space<vmem>>, vector<1x2x128xf32>
    %209 = vector.shape_cast %208 : vector<1x2x128xf32> to vector<2x128xf32>
    %210 = vector.shape_cast %206 : vector<2x128xf32> to vector<1x2x128xf32>
    tpu.vector_store %arg6[%207, %c0_53, %c0_54], %210 {strides = array<i32>} : memref<8x2x128xf32, #tpu.memory_space<vmem>>, vector<1x2x128xf32>,
    %c7_i32 = arith.constant 7 : i32
    %211 = arith.index_cast %c7_i32 : i32 to index
    %c0_55 = arith.constant 0 : index
    %c0_56 = arith.constant 0 : index
    %212 = vector.load %arg2[%211, %c0_55, %c0_56] : memref<8x2x384xf32, #tpu.memory_space<vmem>>, vector<1x2x384xf32>
    %213 = vector.shape_cast %212 : vector<1x2x384xf32> to vector<2x384xf32>
    %cst_57 = arith.constant dense<0.000000e+00> : vector<2x384xf32>
    %214 = tpu.matmul %206, %3, %cst_57 {dimension_numbers = #tpu.dot_dimension_numbers<[1], [0], [0], [1], [0, 0, 1, 1], [], []>} : vector<2x128xf32>, vector<128x384xf32>, vector<2x384xf32> -> vector<2x384xf32>
    %215 = vector.extract_strided_slice %213 {offsets = [0, 0], sizes = [2, 256], strides = [1, 1]} : vector<2x384xf32> to vector<2x256xf32>
    %216 = vector.extract_strided_slice %214 {offsets = [0, 0], sizes = [2, 256], strides = [1, 1]} : vector<2x384xf32> to vector<2x256xf32>
    %217 = arith.addf %215, %216 : vector<2x256xf32>
    %218 = arith.negf %217 : vector<2x256xf32>
    %219 = math.exp %218 : vector<2x256xf32>
    %cst_58 = arith.constant 1.000000e+00 : f32
    %220 = vector.broadcast %cst_58 : f32 to vector<2x256xf32>
    %221 = arith.addf %220, %219 : vector<2x256xf32>
    %222 = arith.divf %220, %221 : vector<2x256xf32>
    %223 = vector.extract_strided_slice %222 {offsets = [0, 0], sizes = [2, 128], strides = [1, 1]} : vector<2x256xf32> to vector<2x128xf32>
    %224 = vector.extract_strided_slice %222 {offsets = [0, 128], sizes = [2, 128], strides = [1, 1]} : vector<2x256xf32> to vector<2x128xf32>
    %225 = vector.extract_strided_slice %213 {offsets = [0, 256], sizes = [2, 128], strides = [1, 1]} : vector<2x384xf32> to vector<2x128xf32>
    %226 = vector.extract_strided_slice %214 {offsets = [0, 256], sizes = [2, 128], strides = [1, 1]} : vector<2x384xf32> to vector<2x128xf32>
    %227 = arith.addf %226, %6 : vector<2x128xf32>
    %228 = arith.mulf %223, %227 : vector<2x128xf32>
    %229 = arith.addf %225, %228 : vector<2x128xf32>
    %230 = math.tanh %229 : vector<2x128xf32>
    %cst_59 = arith.constant 1.000000e+00 : f32
    %231 = vector.broadcast %cst_59 : f32 to vector<2x128xf32>
    %232 = arith.subf %231, %224 : vector<2x128xf32>
    %233 = arith.mulf %232, %230 : vector<2x128xf32>
    %234 = arith.mulf %224, %206 : vector<2x128xf32>
    %235 = arith.addf %233, %234 : vector<2x128xf32>
    %236 = arith.index_cast %c7_i32 : i32 to index
    %c0_60 = arith.constant 0 : index
    %c0_61 = arith.constant 0 : index
    %237 = vector.load %arg6[%236, %c0_60, %c0_61] : memref<8x2x128xf32, #tpu.memory_space<vmem>>, vector<1x2x128xf32>
    %238 = vector.shape_cast %237 : vector<1x2x128xf32> to vector<2x128xf32>
    %239 = vector.shape_cast %235 : vector<2x128xf32> to vector<1x2x128xf32>
    tpu.vector_store %arg6[%236, %c0_60, %c0_61], %239 {strides = array<i32>} : memref<8x2x128xf32, #tpu.memory_space<vmem>>, vector<1x2x128xf32>,
    %c8_i32 = arith.constant 8 : i32
    %c0_62 = arith.constant 0 : index
    %c0_63 = arith.constant 0 : index
    %240 = vector.load %arg8[%c0_62, %c0_63] : memref<2x128xf32, #tpu.memory_space<vmem>>, vector<2x128xf32>
    tpu.vector_store %arg8[%c0_62, %c0_63], %235 {strides = array<i32>} : memref<2x128xf32, #tpu.memory_space<vmem>>, vector<2x128xf32>,
    %c0_i32_64 = arith.constant 0 : i32
    %241 = arith.cmpi eq, %arg1, %c0_i32_64 : i32
    %242 = arith.extui %241 : i1 to i32
    %c0_i32_65 = arith.constant 0 : i32
    %243 = arith.cmpi ne, %242, %c0_i32_65 : i32
    scf.if %243 {
      %c0_66 = arith.constant 0 : index
      %c0_67 = arith.constant 0 : index
      %244 = vector.load %arg7[%c0_66, %c0_67] : memref<2x128xf32, #tpu.memory_space<vmem>>, vector<2x128xf32>
      tpu.vector_store %arg7[%c0_66, %c0_67], %235 {strides = array<i32>} : memref<2x128xf32, #tpu.memory_space<vmem>>, vector<2x128xf32>,
    } else {
    }
    return
  }
  func.func @transform_0(%arg0: i32, %arg1: i32) -> (i32, i32, i32) {
    %c0_i32 = arith.constant 0 : i32
    %c0_i32_0 = arith.constant 0 : i32
    return %arg1, %arg0, %c0_i32 : i32, i32, i32
  }
  func.func @transform_1(%arg0: i32, %arg1: i32) -> (i32, i32) {
    %c0_i32 = arith.constant 0 : i32
    %c0_i32_0 = arith.constant 0 : i32
    %c0_i32_1 = arith.constant 0 : i32
    return %c0_i32, %c0_i32_0 : i32, i32
  }
  func.func @transform_2(%arg0: i32, %arg1: i32) -> (i32, i32) {
    %c0_i32 = arith.constant 0 : i32
    %c0_i32_0 = arith.constant 0 : i32
    %c0_i32_1 = arith.constant 0 : i32
    return %c0_i32, %c0_i32_0 : i32, i32
  }
  func.func @transform_3(%arg0: i32, %arg1: i32) -> (i32, i32) {
    %c0_i32 = arith.constant 0 : i32
    %c0_i32_0 = arith.constant 0 : i32
    return %arg0, %c0_i32 : i32, i32
  }
  func.func @transform_4(%arg0: i32, %arg1: i32) -> (i32, i32, i32) {
    %c0_i32 = arith.constant 0 : i32
    %c0_i32_0 = arith.constant 0 : i32
    return %arg1, %arg0, %c0_i32 : i32, i32, i32
  }
  func.func @transform_5(%arg0: i32, %arg1: i32) -> (i32, i32) {
    %c0_i32 = arith.constant 0 : i32
    %c0_i32_0 = arith.constant 0 : i32
    return %arg0, %c0_i32 : i32, i32
  }
}

</mosaic_0001>

<bundles_post_ra>
// kernel: squeeze.1
= control target key start
LH: loop header
LB: loop body
LE: loop exit
PB: predicated region body
PF: predicated region fallthrough
CT: control target
= control target key end

     0   :  { %s20_s0 = inlined_call_operand.<no memory space> [shape: f32[], index: 0, kind: input, shape index: {}]   ;;  %s21_s1 = inlined_call_operand.vmem [shape: f32[32], index: 1, kind: output, shape index: {}]  }
   0x1   :  { %v2_v0 = vstv %s20_s0 }
   0x2   :  { %3 = vst [vmem:[%s21_s1] sm:$0x1] %v2_v0 }

// kernel: encoder_gru_forward.1
= control target key start
LH: loop header
LB: loop body
LE: loop exit
PB: predicated region body
PF: predicated region fallthrough
CT: control target
= control target key end

     0   :  { %v3221_v3 = vmov 0.0   ;;  %vm2048_vm0 = vmmov 0   ;;  %v2049_v51 = vmov 1983009808   ;;  %v229_v53 = vlaneseq  ;;  %s3215_s1 = inlined_call_operand.vmem [shape: f32[128,384], index: 1, kind: input, shape index: {}]   ;;  %s3216_s3 = inlined_call_operand.vmem [shape: f32[2,128], index: 3, kind: input, shape index: {}]   ;;  %s3217_s0 = inlined_call_operand.vmem [shape: f32[8,2,384], index: 0, kind: input, shape index: {}]   ;;  %s3218_s2 = inlined_call_operand.vmem [shape: f32[1,128], index: 2, kind: input, shape index: {}]   ;;  %s3219_s4 = inlined_call_operand.vmem [shape: f32[8,2,128], index: 4, kind: output, shape index: {0}]   ;;  %s3220_s5 = inlined_call_operand.vmem [shape: f32[2,128], index: 5, kind: output, shape index: {1}]  }
   0x1   :  { %v2083_v0 = vld [vmem:[%s3215_s1 + $0x170] sm:$0xff]  ;;  %v2088_v1 = vld [vmem:[%s3215_s1 + $0x168] sm:$0xff]  ;;  %v2093_v2 = vld [vmem:[%s3215_s1 + $0x158] sm:$0xff]  ;;  %146 = vmatprep.mubr.f32.mxu0 %v3221_v3  ;;  %1667 = vmatprep.subr.mxu1 %v3221_v3  ;;  %v227_v52 = vunpack.c.l.s4 %v2049_v51 }
   0x2   :  { %3240 = vst [vmem:[#allocation3_spill] sm:$0xff] %v2083_v0  ;;  %82 = vmatprep.subr.mxu0 %v2083_v0  ;;  %v2101_v4 = vld [vmem:[%s3215_s1 + $0x150] sm:$0xff]  ;;  %1699 = vmatprep.mubr.msk.f32.mxu1 %vm2048_vm0, %v3221_v3  ;;  %v2109_v5 = vld [vmem:[%s3215_s1 + $0x140] sm:$0xff]  ;;  %v2115_v6 = vld [vmem:[%s3215_s1 + $0x138] sm:$0xff]  ;;  %v230_v55 = vshrl.u32 %v229_v53, 7 }
   0x3   :  { %83 = vmatpush1.msra.mxu0 %v2088_v1  ;;  %v2121_v7 = vld [vmem:[%s3215_s1 + $0x128] sm:$0xff]  ;;  %v2127_v8 = vld [vmem:[%s3215_s1 + $0x120] sm:$0xff]  ;;  %v2133_v9 = vld [vmem:[%s3215_s1 + $0x110] sm:$0xff]  ;;  %v228_v54 = vunpack.c.0.s8 %v227_v52 }
   0x4   :  { %84 = vmatprep.subr.mxu0 %v2093_v2  ;;  %v2139_v10 = vld [vmem:[%s3215_s1 + $0x108] sm:$0xff]  ;;  %v2145_v11 = vld [vmem:[%s3215_s1 + $0xf8] sm:$0xff]  ;;  %v2151_v12 = vld [vmem:[%s3215_s1 + $0xf0] sm:$0xff] }
   0x5   :  { %85 = vmatpush1.msra.mxu0 %v2101_v4  ;;  %v2157_v13 = vld [vmem:[%s3215_s1 + $0xe0] sm:$0xff]  ;;  %v2166_v15 = vld [vmem:[%s3215_s1 + $0xd8] sm:$0xff]  ;;  %v2182_v18 = vld [vmem:[%s3215_s1 + $0xc8] sm:$0xff]  ;;  %v2463_v57 = vsub.s32 %v228_v54, %v230_v55 }
   0x6   :  { %86 = vmatprep.subr.mxu0 %v2109_v5  ;;  %v23_v14 = vld [vmem:[%s3216_s3] sm:$0x3]  ;;  %v2171_v16 = vld [vmem:[%s3215_s1 + $0x178] sm:$0xff]  ;;  %v2195_v20 = vld [vmem:[%s3215_s1 + $0x148] sm:$0xff] }
   0x7   :  { %87 = vmatpush1.msra.mxu0 %v2115_v6  ;;  %24 = vst [vmem:[#allocation2] sm:$0x3] %v23_v14  ;;  %v2176_v17 = vld [vmem:[%s3215_s1 + $0x160] sm:$0xff]  ;;  %1668 = vmatpush3.msra.mxu1 %v2171_v16  ;;  %v2201_v21 = vld [vmem:[%s3215_s1 + $0xb0] sm:$0xff]  ;;  %v2208_v22 = vld [vmem:[%s3215_s1 + $0xa8] sm:$0xff] }
   0x8   :  { %88 = vmatprep.subr.mxu0 %v2121_v7  ;;  %v2189_v19 = vld [vmem:[%s3215_s1 + $0xc0] sm:$0xff]  ;;  %1669 = vmatprep.subr.mxu1 %v3221_v3  ;;  %v2214_v23 = vld [vmem:[%s3215_s1 + $0x130] sm:$0xff]  ;;  %v2220_v24 = vld [vmem:[%s3215_s1 + $0x98] sm:$0xff] }
   0x9   :  { %89 = vmatpush1.msra.mxu0 %v2127_v8  ;;  %1670 = vmatpush3.msra.mxu1 %v2176_v17  ;;  %v2227_v25 = vld [vmem:[%s3215_s1 + $0x90] sm:$0xff]  ;;  %v2233_v26 = vld [vmem:[%s3215_s1 + $0x118] sm:$0xff]  ;;  %v2239_v27 = vld [vmem:[%s3215_s1 + $0x80] sm:$0xff] }
   0xa   :  { %90 = vmatprep.subr.mxu0 %v2133_v9  ;;  %1671 = vmatprep.subr.mxu1 %v3221_v3  ;;  %v2246_v28 = vld [vmem:[%s3215_s1 + $0x78] sm:$0xff]  ;;  %v2252_v29 = vld [vmem:[%s3215_s1 + $0x100] sm:$0xff]  ;;  %v2258_v30 = vld [vmem:[%s3215_s1 + $0x68] sm:$0xff] }
   0xb   :  { %91 = vmatpush1.msra.mxu0 %v2139_v10  ;;  %1672 = vmatpush3.msra.mxu1 %v2195_v20  ;;  %v2265_v31 = vld [vmem:[%s3215_s1 + $0x60] sm:$0xff]  ;;  %v2271_v32 = vld [vmem:[%s3215_s1 + $0xe8] sm:$0xff]  ;;  %v2277_v33 = vld [vmem:[%s3215_s1 + $0x50] sm:$0xff] }
   0xc   :  { %92 = vmatprep.subr.mxu0 %v2145_v11  ;;  %1673 = vmatprep.subr.mxu1 %v3221_v3  ;;  %v2284_v34 = vld [vmem:[%s3215_s1 + $0x48] sm:$0xff]  ;;  %v2290_v35 = vld [vmem:[%s3215_s1 + $0xd0] sm:$0xff]  ;;  %v2296_v36 = vld [vmem:[%s3215_s1 + $0x38] sm:$0xff] }
   0xd   :  { %93 = vmatpush1.msra.mxu0 %v2151_v12  ;;  %1674 = vmatpush3.msra.mxu1 %v2214_v23  ;;  %v2303_v37 = vld [vmem:[%s3215_s1 + $0x30] sm:$0xff]  ;;  %v2309_v38 = vld [vmem:[%s3215_s1 + $0xb8] sm:$0xff]  ;;  %v2315_v39 = vld [vmem:[%s3215_s1 + $0x20] sm:$0xff] }
   0xe   :  { %94 = vmatprep.subr.mxu0 %v2157_v13  ;;  %1675 = vmatprep.subr.mxu1 %v3221_v3  ;;  %v2322_v40 = vld [vmem:[%s3215_s1 + $0x18] sm:$0xff]  ;;  %v2328_v41 = vld [vmem:[%s3215_s1 + $0xa0] sm:$0xff]  ;;  %v2334_v42 = vld [vmem:[%s3215_s1 + $0x8] sm:$0xff] }
   0xf   :  { %95 = vmatpush1.msra.mxu0 %v2166_v15  ;;  %1676 = vmatpush3.msra.mxu1 %v2233_v26  ;;  %3241 = vst [vmem:[#allocation4_spill] sm:$0xff] %v2322_v40  ;;  %3242 = vst [vmem:[#allocation5_spill] sm:$0xff] %v2334_v42  ;;  %v2341_v43 = vld [vmem:[%s3215_s1] sm:$0xff]  ;;  %v2347_v44 = vld [vmem:[%s3215_s1 + $0x88] sm:$0xff] }
  0x10   :  { %96 = vmatprep.subr.mxu0 %v2182_v18  ;;  %1677 = vmatprep.subr.mxu1 %v3221_v3  ;;  %3243 = vst [vmem:[#allocation6_spill] sm:$0xff] %v2341_v43  ;;  %v2350_v45 = vld [vmem:[#allocation2] sm:$0x3]  ;;  %v2358_v46 = vld [vmem:[%s3215_s1 + $0x70] sm:$0xff]  ;;  %v2367_v47 = vld [vmem:[%s3215_s1 + $0x58] sm:$0xff] }
  0x11   :  { %97 = vmatpush1.msra.mxu0 %v2189_v19  ;;  %1678 = vmatpush3.msra.mxu1 %v2252_v29  ;;  %v2375_v48 = vld [vmem:[%s3215_s1 + $0x40] sm:$0xff]  ;;  %v2384_v49 = vld [vmem:[%s3215_s1 + $0x28] sm:$0xff]  ;;  %v2393_v50 = vld [vmem:[%s3215_s1 + $0x10] sm:$0xff] }
  0x12   :  { %98 = vmatprep.subr.mxu0 %v2201_v21  ;;  %1679 = vmatprep.subr.mxu1 %v3221_v3  ;;  %3244 = vst [vmem:[#allocation7_spill] sm:$0xff] %v2384_v49  ;;  %3245 = vst [vmem:[#allocation8_spill] sm:$0xff] %v2393_v50  ;;  %v81_v60 = vld [vmem:[%s3217_s0] sm:$0x3f] }
  0x13   :  { %99 = vmatpush1.msra.mxu0 %v2208_v22  ;;  %1680 = vmatpush3.msra.mxu1 %v2271_v32  ;;  %v2472_v52 = vld [vmem:[%s3218_s2] ss:$0 sm:$0xff]  ;;  %v244_v54 = vrot.slane %v81_v60, 4 }
  0x14   :  { %100 = vmatprep.subr.mxu0 %v2220_v24  ;;  %1681 = vmatprep.subr.mxu1 %v3221_v3 }
  0x15   :  { %101 = vmatpush1.msra.mxu0 %v2227_v25  ;;  %1682 = vmatpush3.msra.mxu1 %v2290_v35 }
  0x16   :  { %102 = vmatprep.subr.mxu0 %v2239_v27  ;;  %1683 = vmatprep.subr.mxu1 %v3221_v3 }
  0x17   :  { %103 = vmatpush1.msra.mxu0 %v2246_v28  ;;  %1684 = vmatpush3.msra.mxu1 %v2309_v38 }
  0x18   :  { %104 = vmatprep.subr.mxu0 %v2258_v30  ;;  %1685 = vmatprep.subr.mxu1 %v3221_v3 }
  0x19   :  { %105 = vmatpush1.msra.mxu0 %v2265_v31  ;;  %1686 = vmatpush3.msra.mxu1 %v2328_v41 }
  0x1a   :  { %106 = vmatprep.subr.mxu0 %v2277_v33  ;;  %1687 = vmatprep.subr.mxu1 %v3221_v3 }
  0x1b   :  { %107 = vmatpush1.msra.mxu0 %v2284_v34  ;;  %1688 = vmatpush3.msra.mxu1 %v2347_v44 }
  0x1c   :  { %108 = vmatprep.subr.mxu0 %v2296_v36  ;;  %1689 = vmatprep.subr.mxu1 %v3221_v3 }
  0x1d   :  { %109 = vmatpush1.msra.mxu0 %v2303_v37  ;;  %1690 = vmatpush3.msra.mxu1 %v2358_v46 }
  0x1e   :  { %110 = vmatprep.subr.mxu0 %v2315_v39  ;;  %1691 = vmatprep.subr.mxu1 %v3221_v3 }
  0x1f   :  { %111 = vmatpush1.msra.mxu0 %v2322_v40  ;;  %1692 = vmatpush3.msra.mxu1 %v2367_v47 }
  0x20   :  { %112 = vmatprep.subr.mxu0 %v2334_v42  ;;  %1693 = vmatprep.subr.mxu1 %v3221_v3 }
  0x21   :  { %113 = vmatpush1.msra.mxu0 %v2341_v43  ;;  %1694 = vmatpush3.msra.mxu1 %v2375_v48 }
  0x22   :  { %147 = vmatmul.mubr.f32.vlgmr.msra.gmra.mxu0 %v2350_v45  ;;  %258 = vmatprep.subr.mxu0 %v2083_v0 }
  0x23   :  { %259 = vmatpush1.msra.mxu0 %v2088_v1  ;;  %1695 = vmatprep.subr.mxu1 %v3221_v3 }
  0x24   :  { %260 = vmatprep.subr.mxu0 %v2093_v2  ;;  %1696 = vmatpush3.msra.mxu1 %v2384_v49 }
  0x25   :  { %261 = vmatpush1.msra.mxu0 %v2101_v4  ;;  %1697 = vmatprep.subr.mxu1 %v3221_v3 }
  0x26   :  { %262 = vmatprep.subr.mxu0 %v2109_v5  ;;  %1698 = vmatpush3.msra.mxu1 %v2393_v50 }
  0x27   :  { %263 = vmatpush1.msra.mxu0 %v2115_v6  ;;  %1700 = vmatmul.mubr.f32.vlgmr.msra.gmra.mxu1 %v2350_v45 }
  0x28   :  { %264 = vmatprep.subr.mxu0 %v2121_v7  ;;  %1702 = vmatprep.subr.mxu1 %v3221_v3 }
  0x29   :  { %265 = vmatpush1.msra.mxu0 %v2127_v8  ;;  %1703 = vmatpush3.msra.mxu1 %v2171_v16 }
  0x2a   :  { %266 = vmatprep.subr.mxu0 %v2133_v9  ;;  %1704 = vmatprep.subr.mxu1 %v3221_v3 }
  0x2b   :  { %267 = vmatpush1.msra.mxu0 %v2139_v10  ;;  %1705 = vmatpush3.msra.mxu1 %v2176_v17 }
  0x2c   :  { %268 = vmatprep.subr.mxu0 %v2145_v11  ;;  %1706 = vmatprep.subr.mxu1 %v3221_v3 }
  0x2d   :  { %269 = vmatpush1.msra.mxu0 %v2151_v12  ;;  %1707 = vmatpush3.msra.mxu1 %v2195_v20 }
  0x2e   :  { %270 = vmatprep.subr.mxu0 %v2157_v13  ;;  %1708 = vmatprep.subr.mxu1 %v3221_v3 }
  0x2f   :  { %271 = vmatpush1.msra.mxu0 %v2166_v15  ;;  %1709 = vmatpush3.msra.mxu1 %v2214_v23 }
  0x30   :  { %272 = vmatprep.subr.mxu0 %v2182_v18  ;;  %1710 = vmatprep.subr.mxu1 %v3221_v3 }
  0x31   :  { %273 = vmatpush1.msra.mxu0 %v2189_v19  ;;  %1711 = vmatpush3.msra.mxu1 %v2233_v26 }
  0x32   :  { %274 = vmatprep.subr.mxu0 %v2201_v21  ;;  %1712 = vmatprep.subr.mxu1 %v3221_v3 }
  0x33   :  { %275 = vmatpush1.msra.mxu0 %v2208_v22  ;;  %1713 = vmatpush3.msra.mxu1 %v2252_v29 }
  0x34   :  { %276 = vmatprep.subr.mxu0 %v2220_v24  ;;  %1714 = vmatprep.subr.mxu1 %v3221_v3 }
  0x35   :  { %277 = vmatpush1.msra.mxu0 %v2227_v25  ;;  %1715 = vmatpush3.msra.mxu1 %v2271_v32 }
  0x36   :  { %278 = vmatprep.subr.mxu0 %v2239_v27  ;;  %1716 = vmatprep.subr.mxu1 %v3221_v3 }
  0x37   :  { %279 = vmatpush1.msra.mxu0 %v2246_v28  ;;  %1717 = vmatpush3.msra.mxu1 %v2290_v35 }
  0x38   :  { %280 = vmatprep.subr.mxu0 %v2258_v30  ;;  %1718 = vmatprep.subr.mxu1 %v3221_v3 }
  0x39   :  { %281 = vmatpush1.msra.mxu0 %v2265_v31  ;;  %1719 = vmatpush3.msra.mxu1 %v2309_v38 }
  0x3a   :  { %282 = vmatprep.subr.mxu0 %v2277_v33  ;;  %1720 = vmatprep.subr.mxu1 %v3221_v3 }
  0x3b   :  { %283 = vmatpush1.msra.mxu0 %v2284_v34  ;;  %1721 = vmatpush3.msra.mxu1 %v2328_v41 }
  0x3c   :  { %284 = vmatprep.subr.mxu0 %v2296_v36  ;;  %1722 = vmatprep.subr.mxu1 %v3221_v3 }
  0x3d   :  { %285 = vmatpush1.msra.mxu0 %v2303_v37  ;;  %1723 = vmatpush3.msra.mxu1 %v2347_v44 }
  0x3e   :  { %286 = vmatprep.subr.mxu0 %v2315_v39  ;;  %1724 = vmatprep.subr.mxu1 %v3221_v3 }
  0x3f   :  { %287 = vmatpush1.msra.mxu0 %v2322_v40  ;;  %1725 = vmatpush3.msra.mxu1 %v2358_v46 }
  0x40   :  { %288 = vmatprep.subr.mxu0 %v2334_v42  ;;  %1726 = vmatprep.subr.mxu1 %v3221_v3 }
  0x41   :  { %289 = vmatpush1.msra.mxu0 %v2341_v43  ;;  %322 = vmatprep.mubr.f32.mxu0 %v3221_v3 }
  0x42   :  { %1727 = vmatpush3.msra.mxu1 %v2367_v47  ;;  %1734 = vmatprep.mubr.msk.f32.mxu1 %vm2048_vm0, %v3221_v3 }
  0x43   :  { %1728 = vmatprep.subr.mxu1 %v3221_v3  ;;  %435 = vmatprep.subr.mxu0 %v2083_v0 }
  0x44   :  { %1729 = vmatpush3.msra.mxu1 %v2375_v48 }
  0x45   :  { %1730 = vmatprep.subr.mxu1 %v3221_v3 }
  0x46   :  { %1731 = vmatpush3.msra.mxu1 %v2384_v49 }
  0x47   :  { %1732 = vmatprep.subr.mxu1 %v3221_v3 }
  0x48   :  { %1733 = vmatpush3.msra.mxu1 %v2393_v50 }
  0x49   :  { %1737 = vmatprep.subr.mxu1 %v3221_v3 }
  0xe2   :  { %v148_v56 = vpop.f32.mrf.mxu0 }
  0xe4   :  { %v150_v58 = vpop.f32.mrf.mxu0 }
  0xe5   :  { %v225_v59 = vcombine.low %v148_v56, %v150_v58 }
  0xe7   :  { %v232_v61 = vrot.slane %v225_v59, %v2463_v57  ;;  %v219_v14 = vpop.f32.mrf.mxu1 }
  0xe8   :  { %v241_v53 = vadd.f32 %v2472_v52, %v219_v14 }
  0xe9   :  { %v234_v62 = vadd.f32 %v232_v61, %v81_v60  ;;  %v1701_v3 = vpop.f32.mrf.mxu1 }
  0xeb   :  { %v1509_v63 = vmul.f32 -1.442695, %v234_v62 }
  0xed   :  { %1950 = vpow2.f32 %v1509_v63 }
  0xfa   :  { %v1951_v51 = vpop.eup %1950 }
  0xfb   :  { %v238_v0 = vadd.f32 1.0, %v1951_v51 }
  0xfd   :  { %1952 = vrcp.f32 %v238_v0  ;;  %v3246_v0 = vmov 0.0  }
 0x10a   :  { %v1953_v55 = vpop.eup %1952 }
 0x10b   :  { %v242_v56 = vmul.f32 %v1953_v55, %v241_v53  ;;  %v249_v59 = vrot.slane %v1953_v55, 2 }
 0x10d   :  { %v246_v58 = vadd.f32 %v244_v54, %v242_v56  ;;  %v251_v61 = vsub.f32 1.0, %v249_v59  ;;  %v253_v3 = vmul.f32 %v249_v59, %v2350_v45  ;;  %v3247_v45 = vld [vmem:[#allocation3_spill] sm:$0xff] }
 0x10e   :  { %v1510_v56 = vld [vmem:[%s3217_s0 + $0x6] sm:$0x3f] }
 0x10f   :  { %1954 = vtanh.f32 %v246_v58 }
 0x11c   :  { %v1955_v62 = vpop.eup %1954 }
 0x11d   :  { %v252_v63 = vmul.f32 %v1955_v62, %v251_v61 }
 0x11f   :  { %v2476_v51 = vadd.f32 %v253_v3, %v252_v63 }
 0x121   :  { %255 = vst [vmem:[%s3219_s4] sm:$0x3] %v2476_v51  ;;  %323 = vmatmul.mubr.f32.vlgmr.msra.gmra.mxu0 %v2476_v51  ;;  %1735 = vmatmul.mubr.f32.vlgmr.msra.gmra.mxu1 %v2476_v51 }
 0x122   :  { %436 = vmatpush1.msra.mxu0 %v2088_v1  ;;  %1738 = vmatpush3.msra.mxu1 %v2171_v16 }
 0x123   :  { %437 = vmatprep.subr.mxu0 %v2093_v2  ;;  %1739 = vmatprep.subr.mxu1 %v3246_v0 }
 0x124   :  { %438 = vmatpush1.msra.mxu0 %v2101_v4  ;;  %1740 = vmatpush3.msra.mxu1 %v2176_v17 }
 0x125   :  { %439 = vmatprep.subr.mxu0 %v2109_v5  ;;  %1741 = vmatprep.subr.mxu1 %v3246_v0 }
 0x126   :  { %440 = vmatpush1.msra.mxu0 %v2115_v6  ;;  %1742 = vmatpush3.msra.mxu1 %v2195_v20 }
 0x127   :  { %441 = vmatprep.subr.mxu0 %v2121_v7  ;;  %1743 = vmatprep.subr.mxu1 %v3246_v0 }
 0x128   :  { %442 = vmatpush1.msra.mxu0 %v2127_v8  ;;  %1744 = vmatpush3.msra.mxu1 %v2214_v23 }
 0x129   :  { %443 = vmatprep.subr.mxu0 %v2133_v9  ;;  %1745 = vmatprep.subr.mxu1 %v3246_v0 }
 0x12a   :  { %444 = vmatpush1.msra.mxu0 %v2139_v10  ;;  %1746 = vmatpush3.msra.mxu1 %v2233_v26 }
 0x12b   :  { %445 = vmatprep.subr.mxu0 %v2145_v11  ;;  %1747 = vmatprep.subr.mxu1 %v3246_v0 }
 0x12c   :  { %446 = vmatpush1.msra.mxu0 %v2151_v12  ;;  %1748 = vmatpush3.msra.mxu1 %v2252_v29 }
 0x12d   :  { %447 = vmatprep.subr.mxu0 %v2157_v13  ;;  %1749 = vmatprep.subr.mxu1 %v3246_v0 }
 0x12e   :  { %448 = vmatpush1.msra.mxu0 %v2166_v15  ;;  %1750 = vmatpush3.msra.mxu1 %v2271_v32 }
 0x12f   :  { %449 = vmatprep.subr.mxu0 %v2182_v18  ;;  %1751 = vmatprep.subr.mxu1 %v3246_v0 }
 0x130   :  { %450 = vmatpush1.msra.mxu0 %v2189_v19  ;;  %1752 = vmatpush3.msra.mxu1 %v2290_v35 }
 0x131   :  { %451 = vmatprep.subr.mxu0 %v2201_v21  ;;  %1753 = vmatprep.subr.mxu1 %v3246_v0 }
 0x132   :  { %452 = vmatpush1.msra.mxu0 %v2208_v22  ;;  %1754 = vmatpush3.msra.mxu1 %v2309_v38 }
 0x133   :  { %453 = vmatprep.subr.mxu0 %v2220_v24  ;;  %1755 = vmatprep.subr.mxu1 %v3246_v0 }
 0x134   :  { %454 = vmatpush1.msra.mxu0 %v2227_v25  ;;  %1756 = vmatpush3.msra.mxu1 %v2328_v41 }
 0x135   :  { %455 = vmatprep.subr.mxu0 %v2239_v27  ;;  %1757 = vmatprep.subr.mxu1 %v3246_v0 }
 0x136   :  { %456 = vmatpush1.msra.mxu0 %v2246_v28  ;;  %1758 = vmatpush3.msra.mxu1 %v2347_v44 }
 0x137   :  { %457 = vmatprep.subr.mxu0 %v2258_v30  ;;  %1759 = vmatprep.subr.mxu1 %v3246_v0 }
 0x138   :  { %458 = vmatpush1.msra.mxu0 %v2265_v31  ;;  %1760 = vmatpush3.msra.mxu1 %v2358_v46 }
 0x139   :  { %459 = vmatprep.subr.mxu0 %v2277_v33  ;;  %1761 = vmatprep.subr.mxu1 %v3246_v0 }
 0x13a   :  { %460 = vmatpush1.msra.mxu0 %v2284_v34  ;;  %1762 = vmatpush3.msra.mxu1 %v2367_v47 }
 0x13b   :  { %461 = vmatprep.subr.mxu0 %v2296_v36  ;;  %1763 = vmatprep.subr.mxu1 %v3246_v0 }
 0x13c   :  { %462 = vmatpush1.msra.mxu0 %v2303_v37  ;;  %1764 = vmatpush3.msra.mxu1 %v2375_v48 }
 0x13d   :  { %463 = vmatprep.subr.mxu0 %v2315_v39  ;;  %1765 = vmatprep.subr.mxu1 %v3246_v0 }
 0x13e   :  { %464 = vmatpush1.msra.mxu0 %v2322_v40  ;;  %1766 = vmatpush3.msra.mxu1 %v2384_v49 }
 0x13f   :  { %465 = vmatprep.subr.mxu0 %v2334_v42  ;;  %1767 = vmatprep.subr.mxu1 %v3246_v0 }
 0x140   :  { %466 = vmatpush1.msra.mxu0 %v2341_v43  ;;  %499 = vmatprep.mubr.f32.mxu0 %v3246_v0 }
 0x141   :  { %1768 = vmatpush3.msra.mxu1 %v2393_v50  ;;  %1769 = vmatprep.mubr.msk.f32.mxu1 %vm2048_vm0, %v3246_v0 }
 0x142   :  { %612 = vmatprep.subr.mxu0 %v3247_v45  ;;  %1772 = vmatprep.subr.mxu1 %v3246_v0  ;;  %v420_v45 = vrot.slane %v1510_v56, 4 }
 0x1e1   :  { %v324_v60 = vpop.f32.mrf.mxu0  ;;  %v395_v14 = vpop.f32.mrf.mxu1 }
 0x1e2   :  { %v417_v3 = vadd.f32 %v2472_v52, %v395_v14 }
 0x1e3   :  { %v326_v53 = vpop.f32.mrf.mxu0  ;;  %v1736_v54 = vpop.f32.mrf.mxu1 }
 0x1e4   :  { %v401_v55 = vcombine.low %v324_v60, %v326_v53 }
 0x1e6   :  { %v408_v58 = vrot.slane %v401_v55, %v2463_v57 }
 0x1e8   :  { %v410_v59 = vadd.f32 %v1510_v56, %v408_v58 }
 0x1ea   :  { %v1511_v61 = vmul.f32 -1.442695, %v410_v59 }
 0x1ec   :  { %1956 = vpow2.f32 %v1511_v61  ;;  %v1513_v61 = vld [vmem:[%s3217_s0 + $0xc] sm:$0x3f] }
 0x1f9   :  { %v1957_v62 = vpop.eup %1956 }
 0x1fa   :  { %v414_v63 = vadd.f32 1.0, %v1957_v62 }
 0x1fc   :  { %1958 = vrcp.f32 %v414_v63 }
 0x209   :  { %v1959_v50 = vpop.eup %1958 }
 0x20a   :  { %v418_v43 = vmul.f32 %v1959_v50, %v417_v3  ;;  %v425_v60 = vrot.slane %v1959_v50, 2  ;;  %v3252_v50 = vld [vmem:[#allocation8_spill] sm:$0xff] }
 0x20c   :  { %v422_v42 = vadd.f32 %v420_v45, %v418_v43  ;;  %v427_v53 = vsub.f32 1.0, %v425_v60  ;;  %v429_v40 = vmul.f32 %v425_v60, %v2476_v51  ;;  %v3250_v43 = vld [vmem:[#allocation5_spill] sm:$0xff]  ;;  %v3253_v51 = vld [vmem:[#allocation3_spill] sm:$0xff] }
 0x20e   :  { %1960 = vtanh.f32 %v422_v42  ;;  %v3249_v42 = vld [vmem:[#allocation7_spill] sm:$0xff] }
 0x21b   :  { %v1961_v54 = vpop.eup %1960 }
 0x21c   :  { %v428_v49 = vmul.f32 %v1961_v54, %v427_v53 }
 0x21e   :  { %v2557_v55 = vadd.f32 %v429_v40, %v428_v49  ;;  %v3248_v40 = vld [vmem:[#allocation4_spill] sm:$0xff]  ;;  %v3251_v49 = vld [vmem:[#allocation6_spill] sm:$0xff] }
 0x220   :  { %1512 = vst [vmem:[%s3219_s4 + $0x2] sm:$0x3] %v2557_v55  ;;  %500 = vmatmul.mubr.f32.vlgmr.msra.gmra.mxu0 %v2557_v55  ;;  %1770 = vmatmul.mubr.f32.vlgmr.msra.gmra.mxu1 %v2557_v55 }
 0x221   :  { %613 = vmatpush1.msra.mxu0 %v2088_v1  ;;  %1773 = vmatpush3.msra.mxu1 %v2171_v16 }
 0x222   :  { %614 = vmatprep.subr.mxu0 %v2093_v2  ;;  %1774 = vmatprep.subr.mxu1 %v3246_v0 }
 0x223   :  { %615 = vmatpush1.msra.mxu0 %v2101_v4  ;;  %1775 = vmatpush3.msra.mxu1 %v2176_v17 }
 0x224   :  { %616 = vmatprep.subr.mxu0 %v2109_v5  ;;  %1776 = vmatprep.subr.mxu1 %v3246_v0 }
 0x225   :  { %617 = vmatpush1.msra.mxu0 %v2115_v6  ;;  %1777 = vmatpush3.msra.mxu1 %v2195_v20 }
 0x226   :  { %618 = vmatprep.subr.mxu0 %v2121_v7  ;;  %1778 = vmatprep.subr.mxu1 %v3246_v0 }
 0x227   :  { %619 = vmatpush1.msra.mxu0 %v2127_v8  ;;  %1779 = vmatpush3.msra.mxu1 %v2214_v23 }
 0x228   :  { %620 = vmatprep.subr.mxu0 %v2133_v9  ;;  %1780 = vmatprep.subr.mxu1 %v3246_v0 }
 0x229   :  { %621 = vmatpush1.msra.mxu0 %v2139_v10  ;;  %1781 = vmatpush3.msra.mxu1 %v2233_v26 }
 0x22a   :  { %622 = vmatprep.subr.mxu0 %v2145_v11  ;;  %1782 = vmatprep.subr.mxu1 %v3246_v0 }
 0x22b   :  { %623 = vmatpush1.msra.mxu0 %v2151_v12  ;;  %1783 = vmatpush3.msra.mxu1 %v2252_v29 }
 0x22c   :  { %624 = vmatprep.subr.mxu0 %v2157_v13  ;;  %1784 = vmatprep.subr.mxu1 %v3246_v0 }
 0x22d   :  { %625 = vmatpush1.msra.mxu0 %v2166_v15  ;;  %1785 = vmatpush3.msra.mxu1 %v2271_v32 }
 0x22e   :  { %626 = vmatprep.subr.mxu0 %v2182_v18  ;;  %1786 = vmatprep.subr.mxu1 %v3246_v0 }
 0x22f   :  { %627 = vmatpush1.msra.mxu0 %v2189_v19  ;;  %1787 = vmatpush3.msra.mxu1 %v2290_v35 }
 0x230   :  { %628 = vmatprep.subr.mxu0 %v2201_v21  ;;  %1788 = vmatprep.subr.mxu1 %v3246_v0 }
 0x231   :  { %629 = vmatpush1.msra.mxu0 %v2208_v22  ;;  %1789 = vmatpush3.msra.mxu1 %v2309_v38 }
 0x232   :  { %630 = vmatprep.subr.mxu0 %v2220_v24  ;;  %1790 = vmatprep.subr.mxu1 %v3246_v0 }
 0x233   :  { %631 = vmatpush1.msra.mxu0 %v2227_v25  ;;  %1791 = vmatpush3.msra.mxu1 %v2328_v41 }
 0x234   :  { %632 = vmatprep.subr.mxu0 %v2239_v27  ;;  %1792 = vmatprep.subr.mxu1 %v3246_v0 }
 0x235   :  { %633 = vmatpush1.msra.mxu0 %v2246_v28  ;;  %1793 = vmatpush3.msra.mxu1 %v2347_v44 }
 0x236   :  { %634 = vmatprep.subr.mxu0 %v2258_v30  ;;  %1794 = vmatprep.subr.mxu1 %v3246_v0 }
 0x237   :  { %635 = vmatpush1.msra.mxu0 %v2265_v31  ;;  %1795 = vmatpush3.msra.mxu1 %v2358_v46 }
 0x238   :  { %636 = vmatprep.subr.mxu0 %v2277_v33  ;;  %1796 = vmatprep.subr.mxu1 %v3246_v0 }
 0x239   :  { %637 = vmatpush1.msra.mxu0 %v2284_v34  ;;  %1797 = vmatpush3.msra.mxu1 %v2367_v47 }
 0x23a   :  { %638 = vmatprep.subr.mxu0 %v2296_v36  ;;  %1798 = vmatprep.subr.mxu1 %v3246_v0 }
 0x23b   :  { %639 = vmatpush1.msra.mxu0 %v2303_v37  ;;  %1799 = vmatpush3.msra.mxu1 %v2375_v48 }
 0x23c   :  { %640 = vmatprep.subr.mxu0 %v2315_v39  ;;  %1800 = vmatprep.subr.mxu1 %v3246_v0 }
 0x23d   :  { %641 = vmatpush1.msra.mxu0 %v3248_v40  ;;  %1801 = vmatpush3.msra.mxu1 %v3249_v42 }
 0x23e   :  { %642 = vmatprep.subr.mxu0 %v3250_v43  ;;  %1802 = vmatprep.subr.mxu1 %v3246_v0 }
 0x23f   :  { %643 = vmatpush1.msra.mxu0 %v3251_v49  ;;  %676 = vmatprep.mubr.f32.mxu0 %v3246_v0 }
 0x240   :  { %1803 = vmatpush3.msra.mxu1 %v3252_v50  ;;  %1804 = vmatprep.mubr.msk.f32.mxu1 %vm2048_vm0, %v3246_v0 }
 0x241   :  { %789 = vmatprep.subr.mxu0 %v3253_v51  ;;  %1807 = vmatprep.subr.mxu1 %v3246_v0  ;;  %v597_v51 = vrot.slane %v1513_v61, 4 }
 0x2e0   :  { %v501_v45 = vpop.f32.mrf.mxu0  ;;  %v572_v14 = vpop.f32.mrf.mxu1 }
 0x2e1   :  { %v594_v54 = vadd.f32 %v2472_v52, %v572_v14 }
 0x2e2   :  { %v503_v56 = vpop.f32.mrf.mxu0  ;;  %v1771_v58 = vpop.f32.mrf.mxu1 }
 0x2e3   :  { %v578_v59 = vcombine.low %v501_v45, %v503_v56 }
 0x2e5   :  { %v585_v62 = vrot.slane %v578_v59, %v2463_v57 }
 0x2e7   :  { %v587_v63 = vadd.f32 %v1513_v61, %v585_v62 }
 0x2e9   :  { %v1514_v3 = vmul.f32 -1.442695, %v587_v63 }
 0x2eb   :  { %1962 = vpow2.f32 %v1514_v3  ;;  %v1516_v3 = vld [vmem:[%s3217_s0 + $0x12] sm:$0x3f] }
 0x2f8   :  { %v1963_v60 = vpop.eup %1962 }
 0x2f9   :  { %v591_v53 = vadd.f32 1.0, %v1963_v60 }
 0x2fb   :  { %1964 = vrcp.f32 %v591_v53 }
 0x308   :  { %v1965_v50 = vpop.eup %1964 }
 0x309   :  { %v595_v49 = vmul.f32 %v1965_v50, %v594_v54  ;;  %v602_v45 = vrot.slane %v1965_v50, 2  ;;  %v3259_v50 = vld [vmem:[#allocation3_spill] sm:$0xff] }
 0x30b   :  { %v599_v43 = vadd.f32 %v597_v51, %v595_v49  ;;  %v604_v56 = vsub.f32 1.0, %v602_v45  ;;  %v606_v40 = vmul.f32 %v602_v45, %v2557_v55  ;;  %v3254_v55 = vld [vmem:[#allocation4_spill] sm:$0xff] }
 0x30c   :  { %v3258_v49 = vld [vmem:[#allocation8_spill] sm:$0xff] }
 0x30d   :  { %1966 = vtanh.f32 %v599_v43  ;;  %v3257_v43 = vld [vmem:[#allocation6_spill] sm:$0xff] }
 0x31a   :  { %v1967_v58 = vpop.eup %1966 }
 0x31b   :  { %v605_v42 = vmul.f32 %v1967_v58, %v604_v56 }
 0x31d   :  { %v2638_v59 = vadd.f32 %v606_v40, %v605_v42  ;;  %v3255_v40 = vld [vmem:[#allocation7_spill] sm:$0xff]  ;;  %v3256_v42 = vld [vmem:[#allocation5_spill] sm:$0xff] }
 0x31f   :  { %1515 = vst [vmem:[%s3219_s4 + $0x4] sm:$0x3] %v2638_v59  ;;  %677 = vmatmul.mubr.f32.vlgmr.msra.gmra.mxu0 %v2638_v59  ;;  %1805 = vmatmul.mubr.f32.vlgmr.msra.gmra.mxu1 %v2638_v59 }
 0x320   :  { %790 = vmatpush1.msra.mxu0 %v2088_v1  ;;  %1808 = vmatpush3.msra.mxu1 %v2171_v16 }
 0x321   :  { %791 = vmatprep.subr.mxu0 %v2093_v2  ;;  %1809 = vmatprep.subr.mxu1 %v3246_v0 }
 0x322   :  { %792 = vmatpush1.msra.mxu0 %v2101_v4  ;;  %1810 = vmatpush3.msra.mxu1 %v2176_v17 }
 0x323   :  { %793 = vmatprep.subr.mxu0 %v2109_v5  ;;  %1811 = vmatprep.subr.mxu1 %v3246_v0 }
 0x324   :  { %794 = vmatpush1.msra.mxu0 %v2115_v6  ;;  %1812 = vmatpush3.msra.mxu1 %v2195_v20 }
 0x325   :  { %795 = vmatprep.subr.mxu0 %v2121_v7  ;;  %1813 = vmatprep.subr.mxu1 %v3246_v0 }
 0x326   :  { %796 = vmatpush1.msra.mxu0 %v2127_v8  ;;  %1814 = vmatpush3.msra.mxu1 %v2214_v23 }
 0x327   :  { %797 = vmatprep.subr.mxu0 %v2133_v9  ;;  %1815 = vmatprep.subr.mxu1 %v3246_v0 }
 0x328   :  { %798 = vmatpush1.msra.mxu0 %v2139_v10  ;;  %1816 = vmatpush3.msra.mxu1 %v2233_v26 }
 0x329   :  { %799 = vmatprep.subr.mxu0 %v2145_v11  ;;  %1817 = vmatprep.subr.mxu1 %v3246_v0 }
 0x32a   :  { %800 = vmatpush1.msra.mxu0 %v2151_v12  ;;  %1818 = vmatpush3.msra.mxu1 %v2252_v29 }
 0x32b   :  { %801 = vmatprep.subr.mxu0 %v2157_v13  ;;  %1819 = vmatprep.subr.mxu1 %v3246_v0 }
 0x32c   :  { %802 = vmatpush1.msra.mxu0 %v2166_v15  ;;  %1820 = vmatpush3.msra.mxu1 %v2271_v32 }
 0x32d   :  { %803 = vmatprep.subr.mxu0 %v2182_v18  ;;  %1821 = vmatprep.subr.mxu1 %v3246_v0 }
 0x32e   :  { %804 = vmatpush1.msra.mxu0 %v2189_v19  ;;  %1822 = vmatpush3.msra.mxu1 %v2290_v35 }
 0x32f   :  { %805 = vmatprep.subr.mxu0 %v2201_v21  ;;  %1823 = vmatprep.subr.mxu1 %v3246_v0 }
 0x330   :  { %806 = vmatpush1.msra.mxu0 %v2208_v22  ;;  %1824 = vmatpush3.msra.mxu1 %v2309_v38 }
 0x331   :  { %807 = vmatprep.subr.mxu0 %v2220_v24  ;;  %1825 = vmatprep.subr.mxu1 %v3246_v0 }
 0x332   :  { %808 = vmatpush1.msra.mxu0 %v2227_v25  ;;  %1826 = vmatpush3.msra.mxu1 %v2328_v41 }
 0x333   :  { %809 = vmatprep.subr.mxu0 %v2239_v27  ;;  %1827 = vmatprep.subr.mxu1 %v3246_v0 }
 0x334   :  { %810 = vmatpush1.msra.mxu0 %v2246_v28  ;;  %1828 = vmatpush3.msra.mxu1 %v2347_v44 }
 0x335   :  { %811 = vmatprep.subr.mxu0 %v2258_v30  ;;  %1829 = vmatprep.subr.mxu1 %v3246_v0 }
 0x336   :  { %812 = vmatpush1.msra.mxu0 %v2265_v31  ;;  %1830 = vmatpush3.msra.mxu1 %v2358_v46 }
 0x337   :  { %813 = vmatprep.subr.mxu0 %v2277_v33  ;;  %1831 = vmatprep.subr.mxu1 %v3246_v0 }
 0x338   :  { %814 = vmatpush1.msra.mxu0 %v2284_v34  ;;  %1832 = vmatpush3.msra.mxu1 %v2367_v47 }
 0x339   :  { %815 = vmatprep.subr.mxu0 %v2296_v36  ;;  %1833 = vmatprep.subr.mxu1 %v3246_v0 }
 0x33a   :  { %816 = vmatpush1.msra.mxu0 %v2303_v37  ;;  %1834 = vmatpush3.msra.mxu1 %v2375_v48 }
 0x33b   :  { %817 = vmatprep.subr.mxu0 %v2315_v39  ;;  %1835 = vmatprep.subr.mxu1 %v3246_v0 }
 0x33c   :  { %818 = vmatpush1.msra.mxu0 %v3254_v55  ;;  %1836 = vmatpush3.msra.mxu1 %v3255_v40 }
 0x33d   :  { %819 = vmatprep.subr.mxu0 %v3256_v42  ;;  %1837 = vmatprep.subr.mxu1 %v3246_v0 }
 0x33e   :  { %820 = vmatpush1.msra.mxu0 %v3257_v43  ;;  %853 = vmatprep.mubr.f32.mxu0 %v3246_v0 }
 0x33f   :  { %1838 = vmatpush3.msra.mxu1 %v3258_v49  ;;  %1839 = vmatprep.mubr.msk.f32.mxu1 %vm2048_vm0, %v3246_v0 }
 0x340   :  { %966 = vmatprep.subr.mxu0 %v3259_v50  ;;  %1842 = vmatprep.subr.mxu1 %v3246_v0  ;;  %v774_v50 = vrot.slane %v1516_v3, 4 }
 0x3df   :  { %v678_v51 = vpop.f32.mrf.mxu0  ;;  %v749_v14 = vpop.f32.mrf.mxu1 }
 0x3e0   :  { %v771_v58 = vadd.f32 %v2472_v52, %v749_v14  ;;  %v2942_v14 = vld [vmem:[%s3215_s1 + $0xc8] sm:$0xff] }
 0x3e1   :  { %v680_v61 = vpop.f32.mrf.mxu0  ;;  %v1806_v62 = vpop.f32.mrf.mxu1 }
 0x3e2   :  { %v755_v63 = vcombine.low %v678_v51, %v680_v61 }
 0x3e4   :  { %v762_v60 = vrot.slane %v755_v63, %v2463_v57 }
 0x3e6   :  { %v764_v53 = vadd.f32 %v1516_v3, %v762_v60  ;;  %v2949_v3 = vld [vmem:[%s3215_s1 + $0xc0] sm:$0xff]  ;;  %v2955_v60 = vld [vmem:[%s3215_s1 + $0xd0] sm:$0xff] }
 0x3e8   :  { %v1517_v54 = vmul.f32 -1.442695, %v764_v53  ;;  %v2961_v53 = vld [vmem:[%s3215_s1 + $0xb0] sm:$0xff] }
 0x3ea   :  { %1968 = vpow2.f32 %v1517_v54  ;;  %v2968_v54 = vld [vmem:[%s3215_s1 + $0xa8] sm:$0xff] }
 0x3f7   :  { %v1969_v45 = vpop.eup %1968 }
 0x3f8   :  { %v768_v56 = vadd.f32 1.0, %v1969_v45  ;;  %v2974_v45 = vld [vmem:[%s3215_s1 + $0xb8] sm:$0xff] }
 0x3fa   :  { %1970 = vrcp.f32 %v768_v56  ;;  %v2980_v56 = vld [vmem:[%s3215_s1 + $0x98] sm:$0xff] }
 0x407   :  { %v1971_v49 = vpop.eup %1970 }
 0x408   :  { %v772_v43 = vmul.f32 %v1971_v49, %v771_v58  ;;  %v779_v51 = vrot.slane %v1971_v49, 2  ;;  %v2936_v49 = vld [vmem:[%s3215_s1 + $0xe8] sm:$0xff]  ;;  %v2987_v58 = vld [vmem:[%s3215_s1 + $0x90] sm:$0xff] }
 0x40a   :  { %v776_v42 = vadd.f32 %v774_v50, %v772_v43  ;;  %v781_v61 = vsub.f32 1.0, %v779_v51  ;;  %v783_v55 = vmul.f32 %v779_v51, %v2638_v59  ;;  %v2904_v59 = vld [vmem:[%s3215_s1 + $0xf8] sm:$0xff]  ;;  %v2993_v50 = vld [vmem:[%s3215_s1 + $0xa0] sm:$0xff] }
 0x40b   :  { %v2930_v43 = vld [vmem:[%s3215_s1 + $0xd8] sm:$0xff]  ;;  %v2999_v51 = vld [vmem:[%s3215_s1 + $0x80] sm:$0xff] }
 0x40c   :  { %1972 = vtanh.f32 %v776_v42  ;;  %v2923_v42 = vld [vmem:[%s3215_s1 + $0xe0] sm:$0xff] }
 0x419   :  { %v1973_v62 = vpop.eup %1972 }
 0x41a   :  { %v782_v40 = vmul.f32 %v1973_v62, %v781_v61  ;;  %v3006_v61 = vld [vmem:[%s3215_s1 + $0x78] sm:$0xff]  ;;  %v3012_v62 = vld [vmem:[%s3215_s1 + $0x88] sm:$0xff] }
 0x41c   :  { %v2719_v63 = vadd.f32 %v783_v55, %v782_v40  ;;  %v2911_v55 = vld [vmem:[%s3215_s1 + $0xf0] sm:$0xff]  ;;  %v2917_v40 = vld [vmem:[%s3215_s1 + $0x100] sm:$0xff] }
 0x41e   :  { %1518 = vst [vmem:[%s3219_s4 + $0x6] sm:$0x3] %v2719_v63  ;;  %854 = vmatmul.mubr.f32.vlgmr.msra.gmra.mxu0 %v2719_v63  ;;  %1840 = vmatmul.mubr.f32.vlgmr.msra.gmra.mxu1 %v2719_v63 }
 0x41f   :  { %967 = vmatpush1.msra.mxu0 %v2088_v1  ;;  %1843 = vmatpush3.msra.mxu1 %v2171_v16  ;;  %v3260_v1 = vld [vmem:[#allocation4_spill] sm:$0xff] }
 0x420   :  { %968 = vmatprep.subr.mxu0 %v2093_v2  ;;  %1844 = vmatprep.subr.mxu1 %v3246_v0  ;;  %v3261_v2 = vld [vmem:[#allocation7_spill] sm:$0xff] }
 0x421   :  { %969 = vmatpush1.msra.mxu0 %v2101_v4  ;;  %1845 = vmatpush3.msra.mxu1 %v2176_v17  ;;  %v3262_v4 = vld [vmem:[#allocation5_spill] sm:$0xff] }
 0x422   :  { %970 = vmatprep.subr.mxu0 %v2109_v5  ;;  %1846 = vmatprep.subr.mxu1 %v3246_v0  ;;  %v3263_v5 = vld [vmem:[#allocation6_spill] sm:$0xff] }
 0x423   :  { %971 = vmatpush1.msra.mxu0 %v2115_v6  ;;  %1847 = vmatpush3.msra.mxu1 %v2195_v20  ;;  %v3264_v6 = vld [vmem:[#allocation8_spill] sm:$0xff] }
 0x424   :  { %972 = vmatprep.subr.mxu0 %v2121_v7  ;;  %1848 = vmatprep.subr.mxu1 %v3246_v0  ;;  %v2795_v7 = vld [vmem:[%s3215_s1 + $0x170] sm:$0xff] }
 0x425   :  { %973 = vmatpush1.msra.mxu0 %v2127_v8  ;;  %1849 = vmatpush3.msra.mxu1 %v2214_v23 }
 0x426   :  { %974 = vmatprep.subr.mxu0 %v2133_v9  ;;  %1850 = vmatprep.subr.mxu1 %v3246_v0 }
 0x427   :  { %975 = vmatpush1.msra.mxu0 %v2139_v10  ;;  %1851 = vmatpush3.msra.mxu1 %v2233_v26 }
 0x428   :  { %976 = vmatprep.subr.mxu0 %v2145_v11  ;;  %1852 = vmatprep.subr.mxu1 %v3246_v0 }
 0x429   :  { %977 = vmatpush1.msra.mxu0 %v2151_v12  ;;  %1853 = vmatpush3.msra.mxu1 %v2252_v29 }
 0x42a   :  { %978 = vmatprep.subr.mxu0 %v2157_v13  ;;  %1854 = vmatprep.subr.mxu1 %v3246_v0  ;;  %v1519_v13 = vld [vmem:[%s3217_s0 + $0x18] sm:$0x3f] }
 0x42b   :  { %979 = vmatpush1.msra.mxu0 %v2166_v15  ;;  %1855 = vmatpush3.msra.mxu1 %v2271_v32  ;;  %v2822_v32 = vld [vmem:[%s3215_s1 + $0x178] sm:$0xff] }
 0x42c   :  { %980 = vmatprep.subr.mxu0 %v2182_v18  ;;  %1856 = vmatprep.subr.mxu1 %v3246_v0 }
 0x42d   :  { %981 = vmatpush1.msra.mxu0 %v2189_v19  ;;  %1857 = vmatpush3.msra.mxu1 %v2290_v35  ;;  %v2841_v35 = vld [vmem:[%s3215_s1 + $0x160] sm:$0xff] }
 0x42e   :  { %982 = vmatprep.subr.mxu0 %v2201_v21  ;;  %1858 = vmatprep.subr.mxu1 %v3246_v0  ;;  %v951_v21 = vrot.slane %v1519_v13, 4 }
 0x42f   :  { %983 = vmatpush1.msra.mxu0 %v2208_v22  ;;  %1859 = vmatpush3.msra.mxu1 %v2309_v38  ;;  %v2860_v38 = vld [vmem:[%s3215_s1 + $0x148] sm:$0xff] }
 0x430   :  { %984 = vmatprep.subr.mxu0 %v2220_v24  ;;  %1860 = vmatprep.subr.mxu1 %v3246_v0 }
 0x431   :  { %985 = vmatpush1.msra.mxu0 %v2227_v25  ;;  %1861 = vmatpush3.msra.mxu1 %v2328_v41  ;;  %v2873_v41 = vld [vmem:[%s3215_s1 + $0x120] sm:$0xff] }
 0x432   :  { %986 = vmatprep.subr.mxu0 %v2239_v27  ;;  %1862 = vmatprep.subr.mxu1 %v3246_v0 }
 0x433   :  { %987 = vmatpush1.msra.mxu0 %v2246_v28  ;;  %1863 = vmatpush3.msra.mxu1 %v2347_v44  ;;  %v2879_v44 = vld [vmem:[%s3215_s1 + $0x130] sm:$0xff] }
 0x434   :  { %988 = vmatprep.subr.mxu0 %v2258_v30  ;;  %1864 = vmatprep.subr.mxu1 %v3246_v0 }
 0x435   :  { %989 = vmatpush1.msra.mxu0 %v2265_v31  ;;  %1865 = vmatpush3.msra.mxu1 %v2358_v46  ;;  %v2816_v31 = vld [vmem:[%s3215_s1 + $0x168] sm:$0xff]  ;;  %v2885_v46 = vld [vmem:[%s3215_s1 + $0x110] sm:$0xff] }
 0x436   :  { %990 = vmatprep.subr.mxu0 %v2277_v33  ;;  %1866 = vmatprep.subr.mxu1 %v3246_v0  ;;  %v2828_v33 = vld [vmem:[%s3215_s1 + $0x158] sm:$0xff] }
 0x437   :  { %991 = vmatpush1.msra.mxu0 %v2284_v34  ;;  %1867 = vmatpush3.msra.mxu1 %v2367_v47  ;;  %v2835_v34 = vld [vmem:[%s3215_s1 + $0x150] sm:$0xff]  ;;  %v2892_v47 = vld [vmem:[%s3215_s1 + $0x108] sm:$0xff] }
 0x438   :  { %992 = vmatprep.subr.mxu0 %v2296_v36  ;;  %1868 = vmatprep.subr.mxu1 %v3246_v0  ;;  %v2847_v36 = vld [vmem:[%s3215_s1 + $0x140] sm:$0xff] }
 0x439   :  { %993 = vmatpush1.msra.mxu0 %v2303_v37  ;;  %1869 = vmatpush3.msra.mxu1 %v2375_v48  ;;  %v2854_v37 = vld [vmem:[%s3215_s1 + $0x138] sm:$0xff] }
 0x43a   :  { %994 = vmatprep.subr.mxu0 %v2315_v39  ;;  %1870 = vmatprep.subr.mxu1 %v3246_v0  ;;  %v2866_v39 = vld [vmem:[%s3215_s1 + $0x128] sm:$0xff]  ;;  %v2898_v48 = vld [vmem:[%s3215_s1 + $0x118] sm:$0xff] }
 0x43b   :  { %995 = vmatpush1.msra.mxu0 %v3260_v1  ;;  %1871 = vmatpush3.msra.mxu1 %v3261_v2  ;;  %v3025_v1 = vld [vmem:[%s3215_s1 + $0x60] sm:$0xff]  ;;  %v3031_v2 = vld [vmem:[%s3215_s1 + $0x70] sm:$0xff] }
 0x43c   :  { %996 = vmatprep.subr.mxu0 %v3262_v4  ;;  %1872 = vmatprep.subr.mxu1 %v3246_v0  ;;  %v3037_v4 = vld [vmem:[%s3215_s1 + $0x50] sm:$0xff] }
 0x43d   :  { %997 = vmatpush1.msra.mxu0 %v3263_v5  ;;  %1030 = vmatprep.mubr.f32.mxu0 %v3246_v0  ;;  %v3044_v5 = vld [vmem:[%s3215_s1 + $0x48] sm:$0xff] }
 0x43e   :  { %1873 = vmatpush3.msra.mxu1 %v3264_v6  ;;  %1874 = vmatprep.mubr.msk.f32.mxu1 %vm2048_vm0, %v3246_v0  ;;  %v3050_v6 = vld [vmem:[%s3215_s1 + $0x58] sm:$0xff] }
 0x43f   :  { %1143 = vmatprep.subr.mxu0 %v2795_v7  ;;  %1877 = vmatprep.subr.mxu1 %v3246_v0 }
 0x4de   :  { %v855_v8 = vpop.f32.mrf.mxu0  ;;  %v926_v9 = vpop.f32.mrf.mxu1 }
 0x4df   :  { %v948_v20 = vadd.f32 %v2472_v52, %v926_v9  ;;  %v3063_v9 = vld [vmem:[%s3215_s1 + $0x30] sm:$0xff] }
 0x4e0   :  { %v857_v10 = vpop.f32.mrf.mxu0  ;;  %v1841_v11 = vpop.f32.mrf.mxu1 }
 0x4e1   :  { %v932_v12 = vcombine.low %v855_v8, %v857_v10  ;;  %v3056_v8 = vld [vmem:[%s3215_s1 + $0x38] sm:$0xff]  ;;  %v3069_v10 = vld [vmem:[%s3215_s1 + $0x40] sm:$0xff] }
 0x4e2   :  { %v3075_v11 = vld [vmem:[%s3215_s1 + $0x20] sm:$0xff] }
 0x4e3   :  { %v939_v15 = vrot.slane %v932_v12, %v2463_v57  ;;  %v3082_v12 = vld [vmem:[%s3215_s1 + $0x18] sm:$0xff] }
 0x4e4   :  { %3265 = vst [vmem:[#allocation3_spill] sm:$0xff] %v3082_v12 }
 0x4e5   :  { %v941_v16 = vadd.f32 %v1519_v13, %v939_v15  ;;  %v3088_v13 = vld [vmem:[%s3215_s1 + $0x28] sm:$0xff] }
 0x4e6   :  { %3266 = vst [vmem:[#allocation4_spill] sm:$0xff] %v3088_v13  ;;  %v3094_v15 = vld [vmem:[%s3215_s1 + $0x8] sm:$0xff] }
 0x4e7   :  { %v1520_v17 = vmul.f32 -1.442695, %v941_v16  ;;  %3267 = vst [vmem:[#allocation7_spill] sm:$0xff] %v3094_v15  ;;  %v3101_v16 = vld [vmem:[%s3215_s1] sm:$0xff] }
 0x4e8   :  { %3268 = vst [vmem:[#allocation5_spill] sm:$0xff] %v3101_v16 }
 0x4e9   :  { %1974 = vpow2.f32 %v1520_v17  ;;  %v3108_v17 = vld [vmem:[%s3215_s1 + $0x10] sm:$0xff] }
 0x4ea   :  { %3269 = vst [vmem:[#allocation6_spill] sm:$0xff] %v3108_v17 }
 0x4f6   :  { %v1975_v18 = vpop.eup %1974 }
 0x4f7   :  { %v945_v19 = vadd.f32 1.0, %v1975_v18 }
 0x4f9   :  { %1976 = vrcp.f32 %v945_v19 }
 0x506   :  { %v1977_v22 = vpop.eup %1976 }
 0x507   :  { %v949_v23 = vmul.f32 %v1977_v22, %v948_v20  ;;  %v956_v25 = vrot.slane %v1977_v22, 2 }
 0x509   :  { %v953_v24 = vadd.f32 %v951_v21, %v949_v23  ;;  %v958_v26 = vsub.f32 1.0, %v956_v25  ;;  %v960_v29 = vmul.f32 %v956_v25, %v2719_v63  ;;  %v3018_v63 = vld [vmem:[%s3215_s1 + $0x68] sm:$0xff]  ;;  %v1522_v23 = vld [vmem:[%s3217_s0 + $0x1e] sm:$0x3f] }
 0x50b   :  { %1978 = vtanh.f32 %v953_v24 }
 0x518   :  { %v1979_v27 = vpop.eup %1978 }
 0x519   :  { %v959_v28 = vmul.f32 %v1979_v27, %v958_v26 }
 0x51b   :  { %v2805_v30 = vadd.f32 %v960_v29, %v959_v28  ;;  %v1128_v29 = vrot.slane %v1522_v23, 4 }
 0x51d   :  { %1521 = vst [vmem:[%s3219_s4 + $0x8] sm:$0x3] %v2805_v30  ;;  %1031 = vmatmul.mubr.f32.vlgmr.msra.gmra.mxu0 %v2805_v30  ;;  %1875 = vmatmul.mubr.f32.vlgmr.msra.gmra.mxu1 %v2805_v30 }
 0x51e   :  { %1144 = vmatpush1.msra.mxu0 %v2816_v31  ;;  %1878 = vmatpush3.msra.mxu1 %v2822_v32 }
 0x51f   :  { %1145 = vmatprep.subr.mxu0 %v2828_v33  ;;  %1879 = vmatprep.subr.mxu1 %v3246_v0 }
 0x520   :  { %1146 = vmatpush1.msra.mxu0 %v2835_v34  ;;  %1880 = vmatpush3.msra.mxu1 %v2841_v35 }
 0x521   :  { %1147 = vmatprep.subr.mxu0 %v2847_v36  ;;  %1881 = vmatprep.subr.mxu1 %v3246_v0 }
 0x522   :  { %1148 = vmatpush1.msra.mxu0 %v2854_v37  ;;  %1882 = vmatpush3.msra.mxu1 %v2860_v38 }
 0x523   :  { %1149 = vmatprep.subr.mxu0 %v2866_v39  ;;  %1883 = vmatprep.subr.mxu1 %v3246_v0 }
 0x524   :  { %1150 = vmatpush1.msra.mxu0 %v2873_v41  ;;  %1884 = vmatpush3.msra.mxu1 %v2879_v44 }
 0x525   :  { %1151 = vmatprep.subr.mxu0 %v2885_v46  ;;  %1885 = vmatprep.subr.mxu1 %v3246_v0 }
 0x526   :  { %1152 = vmatpush1.msra.mxu0 %v2892_v47  ;;  %1886 = vmatpush3.msra.mxu1 %v2898_v48 }
 0x527   :  { %1153 = vmatprep.subr.mxu0 %v2904_v59  ;;  %1887 = vmatprep.subr.mxu1 %v3246_v0 }
 0x528   :  { %1154 = vmatpush1.msra.mxu0 %v2911_v55  ;;  %1888 = vmatpush3.msra.mxu1 %v2917_v40 }
 0x529   :  { %1155 = vmatprep.subr.mxu0 %v2923_v42  ;;  %1889 = vmatprep.subr.mxu1 %v3246_v0 }
 0x52a   :  { %1156 = vmatpush1.msra.mxu0 %v2930_v43  ;;  %1890 = vmatpush3.msra.mxu1 %v2936_v49 }
 0x52b   :  { %1157 = vmatprep.subr.mxu0 %v2942_v14  ;;  %1891 = vmatprep.subr.mxu1 %v3246_v0 }
 0x52c   :  { %1158 = vmatpush1.msra.mxu0 %v2949_v3  ;;  %1892 = vmatpush3.msra.mxu1 %v2955_v60 }
 0x52d   :  { %1159 = vmatprep.subr.mxu0 %v2961_v53  ;;  %1893 = vmatprep.subr.mxu1 %v3246_v0 }
 0x52e   :  { %1160 = vmatpush1.msra.mxu0 %v2968_v54  ;;  %1894 = vmatpush3.msra.mxu1 %v2974_v45 }
 0x52f   :  { %1161 = vmatprep.subr.mxu0 %v2980_v56  ;;  %1895 = vmatprep.subr.mxu1 %v3246_v0 }
 0x530   :  { %1162 = vmatpush1.msra.mxu0 %v2987_v58  ;;  %1896 = vmatpush3.msra.mxu1 %v2993_v50 }
 0x531   :  { %1163 = vmatprep.subr.mxu0 %v2999_v51  ;;  %1897 = vmatprep.subr.mxu1 %v3246_v0 }
 0x532   :  { %1164 = vmatpush1.msra.mxu0 %v3006_v61  ;;  %1898 = vmatpush3.msra.mxu1 %v3012_v62 }
 0x533   :  { %1165 = vmatprep.subr.mxu0 %v3018_v63  ;;  %1899 = vmatprep.subr.mxu1 %v3246_v0 }
 0x534   :  { %1166 = vmatpush1.msra.mxu0 %v3025_v1  ;;  %1900 = vmatpush3.msra.mxu1 %v3031_v2 }
 0x535   :  { %1167 = vmatprep.subr.mxu0 %v3037_v4  ;;  %1901 = vmatprep.subr.mxu1 %v3246_v0 }
 0x536   :  { %1168 = vmatpush1.msra.mxu0 %v3044_v5  ;;  %1902 = vmatpush3.msra.mxu1 %v3050_v6 }
 0x537   :  { %1169 = vmatprep.subr.mxu0 %v3056_v8  ;;  %1903 = vmatprep.subr.mxu1 %v3246_v0 }
 0x538   :  { %1170 = vmatpush1.msra.mxu0 %v3063_v9  ;;  %1904 = vmatpush3.msra.mxu1 %v3069_v10 }
 0x539   :  { %1171 = vmatprep.subr.mxu0 %v3075_v11  ;;  %1905 = vmatprep.subr.mxu1 %v3246_v0 }
 0x53a   :  { %1172 = vmatpush1.msra.mxu0 %v3082_v12  ;;  %1906 = vmatpush3.msra.mxu1 %v3088_v13 }
 0x53b   :  { %1173 = vmatprep.subr.mxu0 %v3094_v15  ;;  %1907 = vmatprep.subr.mxu1 %v3246_v0 }
 0x53c   :  { %1174 = vmatpush1.msra.mxu0 %v3101_v16  ;;  %1207 = vmatprep.mubr.f32.mxu0 %v3246_v0 }
 0x53d   :  { %1908 = vmatpush3.msra.mxu1 %v3108_v17  ;;  %1909 = vmatprep.mubr.msk.f32.mxu1 %vm2048_vm0, %v3246_v0 }
 0x53e   :  { %1320 = vmatprep.subr.mxu0 %v2795_v7  ;;  %1912 = vmatprep.subr.mxu1 %v3246_v0 }
 0x5dd   :  { %v1032_v18 = vpop.f32.mrf.mxu0  ;;  %v1103_v19 = vpop.f32.mrf.mxu1 }
 0x5de   :  { %v1125_v7 = vadd.f32 %v2472_v52, %v1103_v19  ;;  %v3270_v52 = vld [vmem:[#allocation3_spill] sm:$0xff] }
 0x5df   :  { %v1034_v20 = vpop.f32.mrf.mxu0  ;;  %v1876_v21 = vpop.f32.mrf.mxu1 }
 0x5e0   :  { %v1109_v22 = vcombine.low %v1032_v18, %v1034_v20 }
 0x5e2   :  { %v1116_v24 = vrot.slane %v1109_v22, %v2463_v57 }
 0x5e4   :  { %v1118_v25 = vadd.f32 %v1522_v23, %v1116_v24 }
 0x5e6   :  { %v1523_v26 = vmul.f32 -1.442695, %v1118_v25 }
 0x5e8   :  { %1980 = vpow2.f32 %v1523_v26 }
 0x5f5   :  { %v1981_v27 = vpop.eup %1980 }
 0x5f6   :  { %v1122_v28 = vadd.f32 1.0, %v1981_v27 }
 0x5f8   :  { %1982 = vrcp.f32 %v1122_v28 }
 0x605   :  { %v1983_v17 = vpop.eup %1982 }
 0x606   :  { %v1126_v16 = vmul.f32 %v1983_v17, %v1125_v7  ;;  %v1133_v18 = vrot.slane %v1983_v17, 2 }
 0x608   :  { %v1130_v15 = vadd.f32 %v1128_v29, %v1126_v16  ;;  %v1135_v20 = vsub.f32 1.0, %v1133_v18  ;;  %v1137_v12 = vmul.f32 %v1133_v18, %v2805_v30  ;;  %v3271_v30 = vld [vmem:[#allocation4_spill] sm:$0xff] }
 0x60a   :  { %1984 = vtanh.f32 %v1130_v15 }
 0x617   :  { %v1985_v21 = vpop.eup %1984 }
 0x618   :  { %v1136_v13 = vmul.f32 %v1985_v21, %v1135_v20 }
 0x61a   :  { %v3121_v22 = vadd.f32 %v1137_v12, %v1136_v13 }
 0x61c   :  { %1524 = vst [vmem:[%s3219_s4 + $0xa] sm:$0x3] %v3121_v22  ;;  %1208 = vmatmul.mubr.f32.vlgmr.msra.gmra.mxu0 %v3121_v22  ;;  %1910 = vmatmul.mubr.f32.vlgmr.msra.gmra.mxu1 %v3121_v22 }
 0x61d   :  { %1321 = vmatpush1.msra.mxu0 %v2816_v31  ;;  %1913 = vmatpush3.msra.mxu1 %v2822_v32  ;;  %v3272_v31 = vld [vmem:[#allocation7_spill] sm:$0xff]  ;;  %v3273_v32 = vld [vmem:[#allocation5_spill] sm:$0xff] }
 0x61e   :  { %1322 = vmatprep.subr.mxu0 %v2828_v33  ;;  %1914 = vmatprep.subr.mxu1 %v3246_v0  ;;  %v3274_v33 = vld [vmem:[#allocation6_spill] sm:$0xff] }
 0x61f   :  { %1323 = vmatpush1.msra.mxu0 %v2835_v34  ;;  %1915 = vmatpush3.msra.mxu1 %v2841_v35 }
 0x620   :  { %1324 = vmatprep.subr.mxu0 %v2847_v36  ;;  %1916 = vmatprep.subr.mxu1 %v3246_v0 }
 0x621   :  { %1325 = vmatpush1.msra.mxu0 %v2854_v37  ;;  %1917 = vmatpush3.msra.mxu1 %v2860_v38 }
 0x622   :  { %1326 = vmatprep.subr.mxu0 %v2866_v39  ;;  %1918 = vmatprep.subr.mxu1 %v3246_v0  ;;  %v1525_v39 = vld [vmem:[%s3217_s0 + $0x24] sm:$0x3f] }
 0x623   :  { %1327 = vmatpush1.msra.mxu0 %v2873_v41  ;;  %1919 = vmatpush3.msra.mxu1 %v2879_v44 }
 0x624   :  { %1328 = vmatprep.subr.mxu0 %v2885_v46  ;;  %1920 = vmatprep.subr.mxu1 %v3246_v0 }
 0x625   :  { %1329 = vmatpush1.msra.mxu0 %v2892_v47  ;;  %1921 = vmatpush3.msra.mxu1 %v2898_v48 }
 0x626   :  { %1330 = vmatprep.subr.mxu0 %v2904_v59  ;;  %1922 = vmatprep.subr.mxu1 %v3246_v0 }
 0x627   :  { %1331 = vmatpush1.msra.mxu0 %v2911_v55  ;;  %1923 = vmatpush3.msra.mxu1 %v2917_v40  ;;  %v1305_v55 = vrot.slane %v1525_v39, 4 }
 0x628   :  { %1332 = vmatprep.subr.mxu0 %v2923_v42  ;;  %1924 = vmatprep.subr.mxu1 %v3246_v0 }
 0x629   :  { %1333 = vmatpush1.msra.mxu0 %v2930_v43  ;;  %1925 = vmatpush3.msra.mxu1 %v2936_v49 }
 0x62a   :  { %1334 = vmatprep.subr.mxu0 %v2942_v14  ;;  %1926 = vmatprep.subr.mxu1 %v3246_v0 }
 0x62b   :  { %1335 = vmatpush1.msra.mxu0 %v2949_v3  ;;  %1927 = vmatpush3.msra.mxu1 %v2955_v60 }
 0x62c   :  { %1336 = vmatprep.subr.mxu0 %v2961_v53  ;;  %1928 = vmatprep.subr.mxu1 %v3246_v0 }
 0x62d   :  { %1337 = vmatpush1.msra.mxu0 %v2968_v54  ;;  %1929 = vmatpush3.msra.mxu1 %v2974_v45 }
 0x62e   :  { %1338 = vmatprep.subr.mxu0 %v2980_v56  ;;  %1930 = vmatprep.subr.mxu1 %v3246_v0 }
 0x62f   :  { %1339 = vmatpush1.msra.mxu0 %v2987_v58  ;;  %1931 = vmatpush3.msra.mxu1 %v2993_v50 }
 0x630   :  { %1340 = vmatprep.subr.mxu0 %v2999_v51  ;;  %1932 = vmatprep.subr.mxu1 %v3246_v0 }
 0x631   :  { %1341 = vmatpush1.msra.mxu0 %v3006_v61  ;;  %1933 = vmatpush3.msra.mxu1 %v3012_v62  ;;  %v1528_v61 = vld [vmem:[%s3217_s0 + $0x2a] sm:$0x3f] }
 0x632   :  { %1342 = vmatprep.subr.mxu0 %v3018_v63  ;;  %1934 = vmatprep.subr.mxu1 %v3246_v0 }
 0x633   :  { %1343 = vmatpush1.msra.mxu0 %v3025_v1  ;;  %1935 = vmatpush3.msra.mxu1 %v3031_v2 }
 0x634   :  { %1344 = vmatprep.subr.mxu0 %v3037_v4  ;;  %1936 = vmatprep.subr.mxu1 %v3246_v0 }
 0x635   :  { %1345 = vmatpush1.msra.mxu0 %v3044_v5  ;;  %1937 = vmatpush3.msra.mxu1 %v3050_v6  ;;  %v1482_v6 = vrot.slane %v1528_v61, 4 }
 0x636   :  { %1346 = vmatprep.subr.mxu0 %v3056_v8  ;;  %1938 = vmatprep.subr.mxu1 %v3246_v0 }
 0x637   :  { %1347 = vmatpush1.msra.mxu0 %v3063_v9  ;;  %1939 = vmatpush3.msra.mxu1 %v3069_v10 }
 0x638   :  { %1348 = vmatprep.subr.mxu0 %v3075_v11  ;;  %1940 = vmatprep.subr.mxu1 %v3246_v0 }
 0x639   :  { %1349 = vmatpush1.msra.mxu0 %v3270_v52  ;;  %1941 = vmatpush3.msra.mxu1 %v3271_v30 }
 0x63a   :  { %1350 = vmatprep.subr.mxu0 %v3272_v31  ;;  %1942 = vmatprep.subr.mxu1 %v3246_v0 }
 0x63b   :  { %1351 = vmatpush1.msra.mxu0 %v3273_v32  ;;  %1384 = vmatprep.mubr.f32.mxu0 %v3246_v0 }
 0x63c   :  { %1943 = vmatpush3.msra.mxu1 %v3274_v33  ;;  %1944 = vmatprep.mubr.msk.f32.mxu1 %vm2048_vm0, %v3246_v0  ;;  %v2046_v0 = vld [vmem:[%s3218_s2] ss:$0 sm:$0xff] }
 0x6dc   :  { %v1209_v34 = vpop.f32.mrf.mxu0  ;;  %v1280_v35 = vpop.f32.mrf.mxu1 }
 0x6dd   :  { %v1302_v59 = vadd.f32 %v2046_v0, %v1280_v35 }
 0x6de   :  { %v1211_v36 = vpop.f32.mrf.mxu0  ;;  %v1911_v37 = vpop.f32.mrf.mxu1 }
 0x6df   :  { %v1286_v38 = vcombine.low %v1209_v34, %v1211_v36 }
 0x6e1   :  { %v1293_v41 = vrot.slane %v1286_v38, %v2463_v57 }
 0x6e3   :  { %v1295_v44 = vadd.f32 %v1525_v39, %v1293_v41 }
 0x6e5   :  { %v1526_v46 = vmul.f32 -1.442695, %v1295_v44 }
 0x6e7   :  { %1986 = vpow2.f32 %v1526_v46 }
 0x6f4   :  { %v1987_v47 = vpop.eup %1986 }
 0x6f5   :  { %v1299_v48 = vadd.f32 1.0, %v1987_v47 }
 0x6f7   :  { %1988 = vrcp.f32 %v1299_v48 }
 0x704   :  { %v1989_v40 = vpop.eup %1988 }
 0x705   :  { %v1303_v42 = vmul.f32 %v1989_v40, %v1302_v59  ;;  %v1310_v49 = vrot.slane %v1989_v40, 2 }
 0x707   :  { %v1307_v43 = vadd.f32 %v1305_v55, %v1303_v42  ;;  %v1312_v14 = vsub.f32 1.0, %v1310_v49  ;;  %v1314_v53 = vmul.f32 %v1310_v49, %v3121_v22 }
 0x709   :  { %1990 = vtanh.f32 %v1307_v43 }
 0x716   :  { %v1991_v3 = vpop.eup %1990 }
 0x717   :  { %v1313_v60 = vmul.f32 %v1991_v3, %v1312_v14 }
 0x719   :  { %v1315_v54 = vadd.f32 %v1314_v53, %v1313_v60 }
 0x71b   :  { %1527 = vst [vmem:[%s3219_s4 + $0xc] sm:$0x3] %v1315_v54  ;;  %1385 = vmatmul.mubr.f32.vlgmr.msra.gmra.mxu0 %v1315_v54  ;;  %1945 = vmatmul.mubr.f32.vlgmr.msra.gmra.mxu1 %v1315_v54 }
 0x7db   :  { %v1386_v45 = vpop.f32.mrf.mxu0  ;;  %v1457_v56 = vpop.f32.mrf.mxu1 }
 0x7dc   :  { %v1479_v5 = vadd.f32 %v2046_v0, %v1457_v56 }
 0x7dd   :  { %v1388_v58 = vpop.f32.mrf.mxu0  ;;  %v1946_v50 = vpop.f32.mrf.mxu1 }
 0x7de   :  { %v1463_v51 = vcombine.low %v1386_v45, %v1388_v58 }
 0x7e0   :  { %v1470_v62 = vrot.slane %v1463_v51, %v2463_v57 }
 0x7e2   :  { %v1472_v63 = vadd.f32 %v1528_v61, %v1470_v62 }
 0x7e4   :  { %v1529_v1 = vmul.f32 -1.442695, %v1472_v63 }
 0x7e6   :  { %1992 = vpow2.f32 %v1529_v1 }
 0x7f3   :  { %v1993_v2 = vpop.eup %1992 }
 0x7f4   :  { %v1476_v4 = vadd.f32 1.0, %v1993_v2 }
 0x7f6   :  { %1994 = vrcp.f32 %v1476_v4 }
 0x803   :  { %v1995_v8 = vpop.eup %1994 }
 0x804   :  { %v1480_v9 = vmul.f32 %v1995_v8, %v1479_v5  ;;  %v1487_v11 = vrot.slane %v1995_v8, 2 }
 0x806   :  { %v1484_v10 = vadd.f32 %v1482_v6, %v1480_v9  ;;  %v1489_v12 = vsub.f32 1.0, %v1487_v11  ;;  %v1491_v16 = vmul.f32 %v1487_v11, %v1315_v54 }
 0x808   :  { %1996 = vtanh.f32 %v1484_v10 }
 0x815   :  { %v1997_v13 = vpop.eup %1996 }
 0x816   :  { %v1490_v15 = vmul.f32 %v1997_v13, %v1489_v12 }
 0x818   :  { %v1492_v17 = vadd.f32 %v1491_v16, %v1490_v15 }
 0x81a   :  { %1530 = vst [vmem:[%s3219_s4 + $0xe] sm:$0x3] %v1492_v17  ;;  %1495 = vst [vmem:[#allocation2] sm:$0x3] %v1492_v17 }
 0x81b   :  { %1499 = vst [vmem:[%s3220_s5] sm:$0x3] %v1492_v17 }

</bundles_post_ra>
